<compile_context>
chip_gen: v5e
topology: v5e:2x2
jax: 0.10.0
libtpu: 0.0.40
codegen_flags: <defaults>
</compile_context>

<pallas_src>
import functools

import numpy as np
import jax
import jax.numpy as jnp
from jax import lax
from jax.experimental import pallas as pl
from jax.experimental.pallas import tpu as pltpu

_COMPUTE_DTYPE = jnp.bfloat16  # MXU-native matmul inputs; accumulation stays f32.


def _tpu_vmem_capacity_bytes():
    """Physical VMEM per TensorCore (falls back to the smallest, v7x-sized value)."""
    try:
        return int(pltpu.get_tpu_info().vmem_capacity_bytes)
    except Exception:  # API unavailable / not on TPU: be conservative
        return 64 * 1024 * 1024


_VMEM_CAP = _tpu_vmem_capacity_bytes()
# ~75% of physical VMEM: ~48 MiB on v7x (64 MiB parts), ~96 MiB on v5e/v6e
# (128 MiB parts), leaving headroom for compiler-internal scratch.
_VMEM_LIMIT_BYTES = int(max(32 * 1024 * 1024,
                            min((_VMEM_CAP * 3) // 4, 112 * 1024 * 1024)))
# Bigger row tiles on 128 MiB parts (v5e/v6e); smaller on 64 MiB v7x parts.
_ROW_TARGET = 512 if _VMEM_CAP >= 100 * 1024 * 1024 else 256
_KV_TARGET = 512
_FFN_K_TARGET = 512


def _pick_tile(n, target, quantum=8):
    """Largest multiple-of-`quantum` divisor of n that is <= target (or n itself).

    Divisor-exact tiles keep reduction-axis blocks (KV, FFN hidden) free of ragged
    garbage and satisfy the (8, 128) block-shape rule on the sublane dim.
    """
    if n <= target:
        return n
    t = (target // quantum) * quantum
    while t >= quantum:
        if n % t == 0:
            return t
        t -= quantum
    return n  # no aligned divisor: fall back to full extent (correctness first)


def _single_buffered():
    try:
        return pl.Buffered(1)
    except TypeError:
        return pl.Buffered(buffer_count=1)


def _invariant_spec(block_shape, index_map, nbytes):
    """BlockSpec for a grid-invariant block.

    Pallas double-buffers every input by default; a block whose index never changes
    only needs one buffer. Only applied when the block is big enough for the second
    buffer to matter for the VMEM budget (e.g. large QKV / out-proj weights on v7x).
    """
    if nbytes >= (1 << 20):
        try:
            return pl.BlockSpec(block_shape, index_map,
                                pipeline_mode=_single_buffered())
        except TypeError:
            pass  # pipeline_mode unavailable: fall back to the default spec
    return pl.BlockSpec(block_shape, index_map)


# ----------------------- Kernel 1: LN0 + fused QKV proj -----------------------
def _ln_qkv_kernel(x_ref, lnw_ref, lnb_ref, w_ref, b_ref, q_ref, kv_ref,
                   *, eps, q_scale):
    x = x_ref[...].astype(jnp.float32)
    u = jnp.mean(x, axis=-1, keepdims=True)
    xc = x - u
    var = jnp.mean(xc * xc, axis=-1, keepdims=True)
    xn = xc * lax.rsqrt(var + eps)
    xn = lnw_ref[...].astype(jnp.float32) * xn + lnb_ref[...].astype(jnp.float32)
    y = jnp.dot(xn.astype(w_ref.dtype), w_ref[...],
                preferred_element_type=jnp.float32)
    y = y + b_ref[...].astype(jnp.float32)
    E = q_ref.shape[-1]
    # Softmax scale folded into the Q output (saves an f32 round trip per attn tile).
    q_ref[...] = (y[:, :E] * q_scale).astype(q_ref.dtype)
    kv_ref[...] = y[:, E:].astype(kv_ref.dtype)


def ln_qkv_proj(x2d, ln_w, ln_b, w_qkv, b_qkv, *, num_heads, eps=1e-12,
                out_dtype=_COMPUTE_DTYPE):
    N, E = x2d.shape
    D3 = w_qkv.shape[1]
    tm = _pick_tile(N, _ROW_TARGET)
    q_scale = float(E // num_heads) ** -0.5
    cost = pl.CostEstimate(
        flops=int(2 * N * E * D3 + 10 * N * E),
        transcendentals=int(N),
        bytes_accessed=int(N * E * x2d.dtype.itemsize
                           + E * D3 * w_qkv.dtype.itemsize
                           + N * D3 * np.dtype(out_dtype).itemsize))
    return pl.pallas_call(
        functools.partial(_ln_qkv_kernel, eps=eps, q_scale=q_scale),
        out_shape=(jax.ShapeDtypeStruct((N, E), out_dtype),
                   jax.ShapeDtypeStruct((N, 2 * E), out_dtype)),
        grid=(pl.cdiv(N, tm),),
        in_specs=[
            pl.BlockSpec((tm, E), lambda i: (i, 0)),
            pl.BlockSpec((1, E), lambda i: (0, 0)),
            pl.BlockSpec((1, E), lambda i: (0, 0)),
            _invariant_spec((E, D3), lambda i: (0, 0),
                            E * D3 * w_qkv.dtype.itemsize),
            pl.BlockSpec((1, D3), lambda i: (0, 0)),
        ],
        out_specs=(pl.BlockSpec((tm, E), lambda i: (i, 0)),
                   pl.BlockSpec((tm, 2 * E), lambda i: (i, 0))),
        compiler_params=pltpu.CompilerParams(
            dimension_semantics=("parallel",),
            vmem_limit_bytes=_VMEM_LIMIT_BYTES),
        cost_estimate=cost,
    )(x2d, ln_w.reshape(1, E), ln_b.reshape(1, E), w_qkv, b_qkv.reshape(1, D3))


# ------------------- Kernel 2: flash-style self-attention ----------------------
def _attention_kernel(q_ref, kv_ref, o_ref, m_sc, l_sc, acc_sc, *, num_heads):
    E = o_ref.shape[-1]
    H = num_heads
    Dh = E // H
    cdt = kv_ref.dtype
    kvi = pl.program_id(2)
    last = kvi == pl.num_programs(2) - 1

    @pl.when(kvi == 0)
    def _():
        m_sc[...] = jnp.full(m_sc.shape, -jnp.inf, dtype=m_sc.dtype)
        l_sc[...] = jnp.zeros_like(l_sc)
        acc_sc[...] = jnp.zeros_like(acc_sc)

    for h in range(H):                              # static unroll over heads
        lo, hi = h * Dh, (h + 1) * Dh
        q = q_ref[0, :, lo:hi]                      # (tq, Dh), pre-scaled by Dh**-0.5
        k = kv_ref[0, :, lo:hi]                     # (tkv, Dh)
        v = kv_ref[0, :, E + lo:E + hi]             # (tkv, Dh)
        # QK^T in NT form (contract Dh of both operands) — no explicit transpose.
        s = lax.dot_general(q, k, (((1,), (1,)), ((), ())),
                            preferred_element_type=jnp.float32)     # (tq, tkv)
        m_prev = m_sc[h]                                             # (tq, 1)
        m_new = jnp.maximum(m_prev, jnp.max(s, axis=-1, keepdims=True))
        alpha = jnp.exp(m_prev - m_new)
        p = jnp.exp(s - m_new)
        l_new = alpha * l_sc[h] + jnp.sum(p, axis=-1, keepdims=True)
        m_sc[h] = m_new
        l_sc[h] = l_new
        pv = jnp.dot(p.astype(cdt), v, preferred_element_type=jnp.float32)  # (tq, Dh)
        # Fold the 1/l normalization into the last KV step so the output store
        # below is a single lane-dense (tq, E) store (EUP reciprocal is ~free).
        inv = pl.reciprocal(l_new, approx=True)
        scale = jnp.where(last, inv, jnp.ones_like(inv))
        acc_sc[:, lo:hi] = (alpha * acc_sc[:, lo:hi] + pv) * scale

    @pl.when(last)
    def _():
        o_ref[0, :, :] = acc_sc[...].astype(o_ref.dtype)   # one lane-dense store


def attention(q3, kv3, *, num_heads, out_dtype=_COMPUTE_DTYPE):
    # q3: (B, S, E) pre-scaled queries; kv3: (B, S, 2E) packed [k | v].
    B, S, E = q3.shape
    tq = _pick_tile(S, _ROW_TARGET)
    tkv = _pick_tile(S, _KV_TARGET)
    cost = pl.CostEstimate(
        flops=int(4 * B * S * S * E),
        transcendentals=int(B * num_heads * S * S),
        bytes_accessed=int(B * S * 3 * E * q3.dtype.itemsize
                           + B * S * E * np.dtype(out_dtype).itemsize))
    return pl.pallas_call(
        functools.partial(_attention_kernel, num_heads=num_heads),
        out_shape=jax.ShapeDtypeStruct((B, S, E), out_dtype),
        grid=(B, pl.cdiv(S, tq), pl.cdiv(S, tkv)),
        in_specs=[
            pl.BlockSpec((1, tq, E), lambda b, qi, ki: (b, qi, 0)),       # Q tile
            pl.BlockSpec((1, tkv, 2 * E), lambda b, qi, ki: (b, ki, 0)),  # KV tile
        ],
        out_specs=pl.BlockSpec((1, tq, E), lambda b, qi, ki: (b, qi, 0)),
        scratch_shapes=[
            pltpu.VMEM((num_heads, tq, 1), jnp.float32),   # running max per head
            pltpu.VMEM((num_heads, tq, 1), jnp.float32),   # running denom per head
            pltpu.VMEM((tq, E), jnp.float32),              # full-width output acc
        ],
        compiler_params=pltpu.CompilerParams(
            dimension_semantics=("parallel", "parallel", "arbitrary"),
            vmem_limit_bytes=_VMEM_LIMIT_BYTES),
        cost_estimate=cost,
    )(q3, kv3)


# -------- Kernel 3: out-proj + residual + LN1 + FFN(relu) + residual -----------
def _post_attn_ffn_kernel(attn_ref, res_ref, wo_ref, bo_ref, lnw_ref, lnb_ref,
                          w1_ref, b1_ref, w2_ref, b2_ref, o_ref,
                          t_sc, n_sc, acc_sc, *, eps):
    k = pl.program_id(1)
    nk = pl.num_programs(1)

    @pl.when(k == 0)
    def _():
        # attention out-projection + residual add  ->  t  (x after attn block)
        t = jnp.dot(attn_ref[...].astype(wo_ref.dtype), wo_ref[...],
                    preferred_element_type=jnp.float32)
        t = t + bo_ref[...].astype(jnp.float32) + res_ref[...].astype(jnp.float32)
        t_sc[...] = t
        # LN1 (f32 statistics)
        u = jnp.mean(t, axis=-1, keepdims=True)
        tc = t - u
        var = jnp.mean(tc * tc, axis=-1, keepdims=True)
        n = tc * lax.rsqrt(var + eps)
        n = lnw_ref[...].astype(jnp.float32) * n + lnb_ref[...].astype(jnp.float32)
        n_sc[...] = n.astype(n_sc.dtype)
        acc_sc[...] = jnp.zeros_like(acc_sc)

    # FFN K-chunk: acc += relu(n @ w1[:, kblk] + b1[kblk]) @ w2[kblk, :]
    h = jnp.dot(n_sc[...], w1_ref[...], preferred_element_type=jnp.float32)
    h = jnp.maximum(h + b1_ref[...].astype(jnp.float32), 0.0)
    acc_sc[...] += jnp.dot(h.astype(w2_ref.dtype), w2_ref[...],
                           preferred_element_type=jnp.float32)

    @pl.when(k == nk - 1)
    def _():
        y = t_sc[...] + acc_sc[...] + b2_ref[...].astype(jnp.float32)
        o_ref[...] = y.astype(o_ref.dtype)


def post_attn_ffn(attn2d, x2d, wo, bo, ln_w, ln_b, w1, b1, w2, b2,
                  *, eps=1e-12, out_dtype=None):
    N, E = x2d.shape
    F = w1.shape[1]
    tm = _pick_tile(N, _ROW_TARGET)
    tk = _pick_tile(F, _FFN_K_TARGET, quantum=128)
    assert F % tk == 0
    out_dtype = x2d.dtype if out_dtype is None else out_dtype
    cost = pl.CostEstimate(
        flops=int(2 * N * E * E + 4 * N * E * F + 20 * N * E),
        transcendentals=int(N),
        bytes_accessed=int(2 * N * E * x2d.dtype.itemsize
                           + (E * E + 2 * E * F) * wo.dtype.itemsize
                           + N * E * np.dtype(out_dtype).itemsize))
    return pl.pallas_call(
        functools.partial(_post_attn_ffn_kernel, eps=eps),
        out_shape=jax.ShapeDtypeStruct((N, E), out_dtype),
        grid=(pl.cdiv(N, tm), F // tk),
        in_specs=[
            pl.BlockSpec((tm, E), lambda i, k: (i, 0)),   # attention output
            pl.BlockSpec((tm, E), lambda i, k: (i, 0)),   # residual (pre-attn x)
            _invariant_spec((E, E), lambda i, k: (0, 0),
                            E * E * wo.dtype.itemsize),   # wo (grid-invariant)
            pl.BlockSpec((1, E), lambda i, k: (0, 0)),    # bo
            pl.BlockSpec((1, E), lambda i, k: (0, 0)),    # ln1 weight
            pl.BlockSpec((1, E), lambda i, k: (0, 0)),    # ln1 bias
            pl.BlockSpec((E, tk), lambda i, k: (0, k)),   # w1 K-tile
            pl.BlockSpec((1, tk), lambda i, k: (0, k)),   # b1 K-tile
            pl.BlockSpec((tk, E), lambda i, k: (k, 0)),   # w2 K-tile
            pl.BlockSpec((1, E), lambda i, k: (0, 0)),    # b2
        ],
        out_specs=pl.BlockSpec((tm, E), lambda i, k: (i, 0)),
        scratch_shapes=[
            pltpu.VMEM((tm, E), jnp.float32),   # t: residual-added activations
            pltpu.VMEM((tm, E), w1.dtype),      # LN1 output in compute dtype
            pltpu.VMEM((tm, E), jnp.float32),   # FFN accumulator
        ],
        compiler_params=pltpu.CompilerParams(
            dimension_semantics=("parallel", "arbitrary"),
            vmem_limit_bytes=_VMEM_LIMIT_BYTES),
        cost_estimate=cost,
    )(attn2d, x2d, wo, bo.reshape(1, E), ln_w.reshape(1, E), ln_b.reshape(1, E),
      w1, b1.reshape(1, F), w2, b2.reshape(1, E))


# ------------------------------- Full layer ------------------------------------
def transformer_encoder_layer(x, params, *, num_heads, batch_major=False):
    """Pre-LN TransformerEncoderLayer forward (inference; dropouts are identity).

    x: (seq_len, batch, embed_dim) by default (PyTorch layout); pass
    batch_major=True with x of shape (batch, seq, embed_dim) so stacked layers can
    keep the batch-major layout and skip the entry/exit transposes entirely.
    """
    if batch_major:
        B, S, E = x.shape
        xb3 = x
    else:
        S, B, E = x.shape
        xb3 = jnp.transpose(x, (1, 0, 2))
    assert E % num_heads == 0
    N = B * S
    xb = xb3.reshape(N, E)

    # (1) pre-LN + fused QKV projection (Q pre-scaled, KV packed along lanes)
    q2d, kv2d = ln_qkv_proj(xb, params["ln0_w"], params["ln0_b"],
                            params["wqkv"], params["bqkv"], num_heads=num_heads)

    # (2) flash-style self-attention
    attn = attention(q2d.reshape(B, S, E), kv2d.reshape(B, S, 2 * E),
                     num_heads=num_heads)                          # (B, S, E)

    # (3) out-proj + residual + LN1 + FFN(relu) + residual (fused, K-tiled)
    y2 = post_attn_ffn(attn.reshape(N, E), xb,
                       params["wo"], params["bo"],
                       params["ln1_w"], params["ln1_b"],
                       params["w1"], params["b1"],
                       params["w2"], params["b2"])                 # (N, E) f32

    y3 = y2.reshape(B, S, E)
    return y3 if batch_major else jnp.transpose(y3, (1, 0, 2))


# ------------------------------ Param init --------------------------------------
def init_params(key, embed_dim, *, weight_dtype=_COMPUTE_DTYPE):
    E = embed_dim
    F = 4 * E
    ks = jax.random.split(key, 12)
    std = 0.02

    def w(k, shape):
        return (std * jax.random.normal(k, shape, dtype=jnp.float32)).astype(weight_dtype)

    def b(k, shape):
        return 0.02 * jax.random.normal(k, shape, dtype=jnp.float32)

    wq, wk, wv = w(ks[0], (E, E)), w(ks[1], (E, E)), w(ks[2], (E, E))
    bq, bk, bv = b(ks[6], (E,)), b(ks[7], (E,)), b(ks[8], (E,))
    return {
        # fused in-proj, stored as (in, out); weights bf16, biases f32
        "wqkv": jnp.concatenate([wq, wk, wv], axis=1),
        "bqkv": jnp.concatenate([bq, bk, bv], axis=0),
        "wo": w(ks[3], (E, E)), "bo": b(ks[9], (E,)),
        # FFN
        "w1": w(ks[4], (E, F)), "b1": b(ks[10], (F,)),
        "w2": w(ks[5], (F, E)), "b2": b(ks[11], (E,)),
        # LayerNorms (TF-style, eps=1e-12)
        "ln0_w": jnp.ones((E,), jnp.float32), "ln0_b": jnp.zeros((E,), jnp.float32),
        "ln1_w": jnp.ones((E,), jnp.float32), "ln1_b": jnp.zeros((E,), jnp.float32),
    }


# ----------------------------- Pure-JAX reference --------------------------------
def _reference(x, params, *, num_heads, eps=1e-12):
    S, B, E = x.shape
    H = num_heads
    Dh = E // H
    f32 = lambda a: a.astype(jnp.float32)

    def ln(t, w, b):
        u = jnp.mean(t, axis=-1, keepdims=True)
        s = jnp.mean((t - u) ** 2, axis=-1, keepdims=True)
        return w * ((t - u) / jnp.sqrt(s + eps)) + b

    x = f32(x)
    xn = ln(x, params["ln0_w"], params["ln0_b"])
    qkv = xn @ f32(params["wqkv"]) + params["bqkv"]
    q, k, v = jnp.split(qkv, 3, axis=-1)                       # each (S, B, E)

    def heads(t):                                              # -> (B, H, S, Dh)
        return t.reshape(S, B, H, Dh).transpose(1, 2, 0, 3)

    sc = jnp.einsum("bhqd,bhkd->bhqk", heads(q) * Dh ** -0.5, heads(k))
    p = jax.nn.softmax(sc, axis=-1)
    oh = jnp.einsum("bhqk,bhkd->bhqd", p, heads(v))
    attn = oh.transpose(2, 0, 1, 3).reshape(S, B, E)
    t = x + attn @ f32(params["wo"]) + params["bo"]
    n = ln(t, params["ln1_w"], params["ln1_b"])
    h = jax.nn.relu(n @ f32(params["w1"]) + params["b1"])
    return t + h @ f32(params["w2"]) + params["b2"]


if __name__ == "__main__":
    # small shapes: seq=8, batch=2, embed_dim=32, heads=4 (head_dim=8)
    seq_len, batch, embed_dim, num_heads = 8, 2, 32, 4
    key = jax.random.PRNGKey(0)
    k_x, k_p = jax.random.split(key)
    x = jax.random.normal(k_x, (seq_len, batch, embed_dim), dtype=jnp.float32)
    params = init_params(k_p, embed_dim)

    # TODO(synk): mode_K path builds a fresh nn.Linear per call (random weights each
    # call); only the mode_K=None / attention_Q=None self-attention path is implemented.
    fwd = jax.jit(functools.partial(transformer_encoder_layer, num_heads=num_heads))
    out = jax.block_until_ready(fwd(x, params))
    assert out.shape == (seq_len, batch, embed_dim)

    ref = _reference(x, params, num_heads=num_heads)
    err = float(jnp.max(jnp.abs(out.astype(jnp.float32) - ref)))
    assert err < 5e-2, f"max abs error vs reference too large: {err}"
    print("KERNEL_OK")
</pallas_src>

<mosaic_0001>
module attributes {stable_mosaic.version = 11 : i64} {
  func.func @_ln_qkv_kernel(%arg0: i32, %arg1: memref<16x32xf32, #tpu.memory_space<vmem>>, %arg2: memref<1x32xf32, #tpu.memory_space<vmem>>, %arg3: memref<1x32xf32, #tpu.memory_space<vmem>>, %arg4: memref<32x96xbf16, #tpu.memory_space<vmem>>, %arg5: memref<1x96xf32, #tpu.memory_space<vmem>>, %arg6: memref<16x32xbf16, #tpu.memory_space<vmem>>, %arg7: memref<16x64xbf16, #tpu.memory_space<vmem>>) attributes {dimension_semantics = [#tpu.dimension_semantics<parallel>], iteration_bounds = array<i64: 1>, scalar_prefetch = 0 : i64, scratch_operands = 0 : i64, tpu.core_type = #tpu.core_type<tc>, window_params = [{transform_indices = @transform_0, window_bounds = array<i64: 16, 32>}, {pipeline_mode = #tpu.pipeline_mode<synchronous>, transform_indices = @transform_1, window_bounds = array<i64: 1, 32>}, {pipeline_mode = #tpu.pipeline_mode<synchronous>, transform_indices = @transform_2, window_bounds = array<i64: 1, 32>}, {pipeline_mode = #tpu.pipeline_mode<synchronous>, transform_indices = @transform_3, window_bounds = array<i64: 32, 96>}, {pipeline_mode = #tpu.pipeline_mode<synchronous>, transform_indices = @transform_4, window_bounds = array<i64: 1, 96>}, {transform_indices = @transform_5, window_bounds = array<i64: 16, 32>}, {transform_indices = @transform_6, window_bounds = array<i64: 16, 64>}]} {
    %c0 = arith.constant 0 : index
    %c0_0 = arith.constant 0 : index
    %0 = vector.load %arg1[%c0, %c0_0] : memref<16x32xf32, #tpu.memory_space<vmem>>, vector<16x32xf32>
    %cst = arith.constant dense<0.000000e+00> : vector<16xf32>
    %1 = vector.multi_reduction <add>, %0, %cst [1] : vector<16x32xf32> to vector<16xf32>
    %2 = vector.shape_cast %1 : vector<16xf32> to vector<16x1xf32>
    %cst_1 = arith.constant 3.200000e+01 : f32
    %3 = vector.broadcast %cst_1 : f32 to vector<16x1xf32>
    %4 = arith.divf %2, %3 : vector<16x1xf32>
    %5 = vector.broadcast %4 : vector<16x1xf32> to vector<16x32xf32>
    %6 = arith.subf %0, %5 : vector<16x32xf32>
    %7 = arith.mulf %6, %6 : vector<16x32xf32>
    %cst_2 = arith.constant dense<0.000000e+00> : vector<16xf32>
    %8 = vector.multi_reduction <add>, %7, %cst_2 [1] : vector<16x32xf32> to vector<16xf32>
    %9 = vector.shape_cast %8 : vector<16xf32> to vector<16x1xf32>
    %cst_3 = arith.constant 3.200000e+01 : f32
    %10 = vector.broadcast %cst_3 : f32 to vector<16x1xf32>
    %11 = arith.divf %9, %10 : vector<16x1xf32>
    %cst_4 = arith.constant 9.99999996E-13 : f32
    %12 = vector.broadcast %cst_4 : f32 to vector<16x1xf32>
    %13 = arith.addf %11, %12 : vector<16x1xf32>
    %14 = math.rsqrt %13 : vector<16x1xf32>
    %15 = vector.broadcast %14 : vector<16x1xf32> to vector<16x32xf32>
    %16 = arith.mulf %6, %15 : vector<16x32xf32>
    %c0_5 = arith.constant 0 : index
    %c0_6 = arith.constant 0 : index
    %17 = vector.load %arg2[%c0_5, %c0_6] : memref<1x32xf32, #tpu.memory_space<vmem>>, vector<1x32xf32>
    %18 = vector.broadcast %17 : vector<1x32xf32> to vector<16x32xf32>
    %19 = arith.mulf %18, %16 : vector<16x32xf32>
    %c0_7 = arith.constant 0 : index
    %c0_8 = arith.constant 0 : index
    %20 = vector.load %arg3[%c0_7, %c0_8] : memref<1x32xf32, #tpu.memory_space<vmem>>, vector<1x32xf32>
    %21 = vector.broadcast %20 : vector<1x32xf32> to vector<16x32xf32>
    %22 = arith.addf %19, %21 : vector<16x32xf32>
    %23 = arith.truncf %22 : vector<16x32xf32> to vector<16x32xbf16>
    %c0_9 = arith.constant 0 : index
    %c0_10 = arith.constant 0 : index
    %24 = vector.load %arg4[%c0_9, %c0_10] : memref<32x96xbf16, #tpu.memory_space<vmem>>, vector<32x96xbf16>
    %cst_11 = arith.constant dense<0.000000e+00> : vector<16x96xf32>
    %25 = tpu.matmul %23, %24, %cst_11 {dimension_numbers = #tpu.dot_dimension_numbers<[1], [0], [0], [1], [0, 0, 1, 1], [], []>} : vector<16x32xbf16>, vector<32x96xbf16>, vector<16x96xf32> -> vector<16x96xf32>
    %c0_12 = arith.constant 0 : index
    %c0_13 = arith.constant 0 : index
    %26 = vector.load %arg5[%c0_12, %c0_13] : memref<1x96xf32, #tpu.memory_space<vmem>>, vector<1x96xf32>
    %27 = vector.broadcast %26 : vector<1x96xf32> to vector<16x96xf32>
    %28 = arith.addf %25, %27 : vector<16x96xf32>
    %29 = vector.extract_strided_slice %28 {offsets = [0, 0], sizes = [16, 32], strides = [1, 1]} : vector<16x96xf32> to vector<16x32xf32>
    %cst_14 = arith.constant 0.353553385 : f32
    %30 = vector.broadcast %cst_14 : f32 to vector<16x32xf32>
    %31 = arith.mulf %29, %30 : vector<16x32xf32>
    %32 = arith.truncf %31 : vector<16x32xf32> to vector<16x32xbf16>
    %c0_15 = arith.constant 0 : index
    %c0_16 = arith.constant 0 : index
    %33 = vector.load %arg6[%c0_15, %c0_16] : memref<16x32xbf16, #tpu.memory_space<vmem>>, vector<16x32xbf16>
    tpu.vector_store %arg6[%c0_15, %c0_16], %32 {strides = array<i32>} : memref<16x32xbf16, #tpu.memory_space<vmem>>, vector<16x32xbf16>,
    %34 = vector.extract_strided_slice %28 {offsets = [0, 32], sizes = [16, 64], strides = [1, 1]} : vector<16x96xf32> to vector<16x64xf32>
    %35 = arith.truncf %34 : vector<16x64xf32> to vector<16x64xbf16>
    %c0_17 = arith.constant 0 : index
    %c0_18 = arith.constant 0 : index
    %36 = vector.load %arg7[%c0_17, %c0_18] : memref<16x64xbf16, #tpu.memory_space<vmem>>, vector<16x64xbf16>
    tpu.vector_store %arg7[%c0_17, %c0_18], %35 {strides = array<i32>} : memref<16x64xbf16, #tpu.memory_space<vmem>>, vector<16x64xbf16>,
    return
  }
  func.func @transform_0(%arg0: i32) -> (i32, i32) {
    %c0_i32 = arith.constant 0 : i32
    %c0_i32_0 = arith.constant 0 : i32
    return %arg0, %c0_i32 : i32, i32
  }
  func.func @transform_1(%arg0: i32) -> (i32, i32) {
    %c0_i32 = arith.constant 0 : i32
    %c0_i32_0 = arith.constant 0 : i32
    %c0_i32_1 = arith.constant 0 : i32
    return %c0_i32, %c0_i32_0 : i32, i32
  }
  func.func @transform_2(%arg0: i32) -> (i32, i32) {
    %c0_i32 = arith.constant 0 : i32
    %c0_i32_0 = arith.constant 0 : i32
    %c0_i32_1 = arith.constant 0 : i32
    return %c0_i32, %c0_i32_0 : i32, i32
  }
  func.func @transform_3(%arg0: i32) -> (i32, i32) {
    %c0_i32 = arith.constant 0 : i32
    %c0_i32_0 = arith.constant 0 : i32
    %c0_i32_1 = arith.constant 0 : i32
    return %c0_i32, %c0_i32_0 : i32, i32
  }
  func.func @transform_4(%arg0: i32) -> (i32, i32) {
    %c0_i32 = arith.constant 0 : i32
    %c0_i32_0 = arith.constant 0 : i32
    %c0_i32_1 = arith.constant 0 : i32
    return %c0_i32, %c0_i32_0 : i32, i32
  }
  func.func @transform_5(%arg0: i32) -> (i32, i32) {
    %c0_i32 = arith.constant 0 : i32
    %c0_i32_0 = arith.constant 0 : i32
    return %arg0, %c0_i32 : i32, i32
  }
  func.func @transform_6(%arg0: i32) -> (i32, i32) {
    %c0_i32 = arith.constant 0 : i32
    %c0_i32_0 = arith.constant 0 : i32
    return %arg0, %c0_i32 : i32, i32
  }
}

module attributes {stable_mosaic.version = 11 : i64} {
  func.func @_attention_kernel(%arg0: i32, %arg1: i32, %arg2: i32, %arg3: memref<1x8x32xbf16, #tpu.memory_space<vmem>>, %arg4: memref<1x8x64xbf16, #tpu.memory_space<vmem>>, %arg5: memref<1x8x32xbf16, #tpu.memory_space<vmem>>, %arg6: memref<4x8x1xf32, #tpu.memory_space<vmem>>, %arg7: memref<4x8x1xf32, #tpu.memory_space<vmem>>, %arg8: memref<8x32xf32, #tpu.memory_space<vmem>>) attributes {dimension_semantics = [#tpu.dimension_semantics<parallel>, #tpu.dimension_semantics<parallel>, #tpu.dimension_semantics<arbitrary>], iteration_bounds = array<i64: 2, 1, 1>, scalar_prefetch = 0 : i64, scratch_operands = 3 : i64, tpu.core_type = #tpu.core_type<tc>, window_params = [{transform_indices = @transform_0, window_bounds = array<i64: 1, 8, 32>}, {transform_indices = @transform_1, window_bounds = array<i64: 1, 8, 64>}, {transform_indices = @transform_2, window_bounds = array<i64: 1, 8, 32>}]} {
    %c0_i32 = arith.constant 0 : i32
    %0 = arith.cmpi eq, %arg2, %c0_i32 : i32
    %c0_i32_0 = arith.constant 0 : i32
    %1 = arith.cmpi eq, %arg2, %c0_i32_0 : i32
    %2 = arith.extui %1 : i1 to i32
    %c0_i32_1 = arith.constant 0 : i32
    %3 = arith.cmpi ne, %2, %c0_i32_1 : i32
    scf.if %3 {
      %cst_111 = arith.constant 0xFF800000 : f32
      %170 = vector.broadcast %cst_111 : f32 to vector<4x8x1xf32>
      %c0_112 = arith.constant 0 : index
      %c0_113 = arith.constant 0 : index
      %c0_114 = arith.constant 0 : index
      %171 = vector.load %arg6[%c0_112, %c0_113, %c0_114] : memref<4x8x1xf32, #tpu.memory_space<vmem>>, vector<4x8x1xf32>
      tpu.vector_store %arg6[%c0_112, %c0_113, %c0_114], %170 {strides = array<i32>} : memref<4x8x1xf32, #tpu.memory_space<vmem>>, vector<4x8x1xf32>,
      %cst_115 = arith.constant 0.000000e+00 : f32
      %172 = vector.broadcast %cst_115 : f32 to vector<4x8x1xf32>
      %c0_116 = arith.constant 0 : index
      %c0_117 = arith.constant 0 : index
      %c0_118 = arith.constant 0 : index
      %173 = vector.load %arg7[%c0_116, %c0_117, %c0_118] : memref<4x8x1xf32, #tpu.memory_space<vmem>>, vector<4x8x1xf32>
      tpu.vector_store %arg7[%c0_116, %c0_117, %c0_118], %172 {strides = array<i32>} : memref<4x8x1xf32, #tpu.memory_space<vmem>>, vector<4x8x1xf32>,
      %cst_119 = arith.constant 0.000000e+00 : f32
      %174 = vector.broadcast %cst_119 : f32 to vector<8x32xf32>
      %c0_120 = arith.constant 0 : index
      %c0_121 = arith.constant 0 : index
      %175 = vector.load %arg8[%c0_120, %c0_121] : memref<8x32xf32, #tpu.memory_space<vmem>>, vector<8x32xf32>
      tpu.vector_store %arg8[%c0_120, %c0_121], %174 {strides = array<i32>} : memref<8x32xf32, #tpu.memory_space<vmem>>, vector<8x32xf32>,
    } else {
    }
    %c0 = arith.constant 0 : index
    %c0_2 = arith.constant 0 : index
    %c0_3 = arith.constant 0 : index
    %4 = vector.load %arg3[%c0, %c0_2, %c0_3] : memref<1x8x32xbf16, #tpu.memory_space<vmem>>, vector<1x8x8xbf16>
    %5 = vector.shape_cast %4 : vector<1x8x8xbf16> to vector<8x8xbf16>
    %c0_4 = arith.constant 0 : index
    %c0_5 = arith.constant 0 : index
    %c0_6 = arith.constant 0 : index
    %6 = vector.load %arg4[%c0_4, %c0_5, %c0_6] : memref<1x8x64xbf16, #tpu.memory_space<vmem>>, vector<1x8x8xbf16>
    %7 = vector.shape_cast %6 : vector<1x8x8xbf16> to vector<8x8xbf16>
    %c0_7 = arith.constant 0 : index
    %c0_8 = arith.constant 0 : index
    %c32 = arith.constant 32 : index
    %8 = vector.load %arg4[%c0_7, %c0_8, %c32] : memref<1x8x64xbf16, #tpu.memory_space<vmem>>, vector<1x8x8xbf16>
    %9 = vector.shape_cast %8 : vector<1x8x8xbf16> to vector<8x8xbf16>
    %cst = arith.constant dense<0.000000e+00> : vector<8x8xf32>
    %10 = tpu.matmul %5, %7, %cst {dimension_numbers = #tpu.dot_dimension_numbers<[1], [1], [0], [0], [0, 0, 1, 0], [], []>} : vector<8x8xbf16>, vector<8x8xbf16>, vector<8x8xf32> -> vector<8x8xf32>
    %c0_9 = arith.constant 0 : index
    %c0_10 = arith.constant 0 : index
    %c0_11 = arith.constant 0 : index
    %11 = vector.load %arg6[%c0_9, %c0_10, %c0_11] : memref<4x8x1xf32, #tpu.memory_space<vmem>>, vector<1x8x1xf32>
    %12 = vector.shape_cast %11 : vector<1x8x1xf32> to vector<8x1xf32>
    %cst_12 = arith.constant dense<0xFF800000> : vector<8xf32>
    %13 = vector.multi_reduction <maximumf>, %10, %cst_12 [1] : vector<8x8xf32> to vector<8xf32>
    %14 = vector.shape_cast %13 : vector<8xf32> to vector<8x1xf32>
    %15 = arith.maximumf %12, %14 : vector<8x1xf32>
    %16 = arith.subf %12, %15 : vector<8x1xf32>
    %17 = math.exp %16 : vector<8x1xf32>
    %18 = vector.broadcast %15 : vector<8x1xf32> to vector<8x8xf32>
    %19 = arith.subf %10, %18 : vector<8x8xf32>
    %20 = math.exp %19 : vector<8x8xf32>
    %c0_13 = arith.constant 0 : index
    %c0_14 = arith.constant 0 : index
    %c0_15 = arith.constant 0 : index
    %21 = vector.load %arg7[%c0_13, %c0_14, %c0_15] : memref<4x8x1xf32, #tpu.memory_space<vmem>>, vector<1x8x1xf32>
    %22 = vector.shape_cast %21 : vector<1x8x1xf32> to vector<8x1xf32>
    %23 = arith.mulf %17, %22 : vector<8x1xf32>
    %cst_16 = arith.constant dense<0.000000e+00> : vector<8xf32>
    %24 = vector.multi_reduction <add>, %20, %cst_16 [1] : vector<8x8xf32> to vector<8xf32>
    %25 = vector.shape_cast %24 : vector<8xf32> to vector<8x1xf32>
    %26 = arith.addf %23, %25 : vector<8x1xf32>
    %c0_17 = arith.constant 0 : index
    %c0_18 = arith.constant 0 : index
    %c0_19 = arith.constant 0 : index
    %27 = vector.load %arg6[%c0_17, %c0_18, %c0_19] : memref<4x8x1xf32, #tpu.memory_space<vmem>>, vector<1x8x1xf32>
    %28 = vector.shape_cast %27 : vector<1x8x1xf32> to vector<8x1xf32>
    %29 = vector.shape_cast %15 : vector<8x1xf32> to vector<1x8x1xf32>
    tpu.vector_store %arg6[%c0_17, %c0_18, %c0_19], %29 {strides = array<i32>} : memref<4x8x1xf32, #tpu.memory_space<vmem>>, vector<1x8x1xf32>,
    %c0_20 = arith.constant 0 : index
    %c0_21 = arith.constant 0 : index
    %c0_22 = arith.constant 0 : index
    %30 = vector.load %arg7[%c0_20, %c0_21, %c0_22] : memref<4x8x1xf32, #tpu.memory_space<vmem>>, vector<1x8x1xf32>
    %31 = vector.shape_cast %30 : vector<1x8x1xf32> to vector<8x1xf32>
    %32 = vector.shape_cast %26 : vector<8x1xf32> to vector<1x8x1xf32>
    tpu.vector_store %arg7[%c0_20, %c0_21, %c0_22], %32 {strides = array<i32>} : memref<4x8x1xf32, #tpu.memory_space<vmem>>, vector<1x8x1xf32>,
    %33 = arith.truncf %20 : vector<8x8xf32> to vector<8x8xbf16>
    %cst_23 = arith.constant dense<0.000000e+00> : vector<8x8xf32>
    %34 = tpu.matmul %33, %9, %cst_23 {dimension_numbers = #tpu.dot_dimension_numbers<[1], [0], [0], [1], [0, 0, 1, 1], [], []>} : vector<8x8xbf16>, vector<8x8xbf16>, vector<8x8xf32> -> vector<8x8xf32>
    %35 = tpu.reciprocal %26 {approx = true} : vector<8x1xf32> -> vector<8x1xf32>
    %cst_24 = arith.constant 1.000000e+00 : f32
    %36 = vector.broadcast %cst_24 : f32 to vector<8x1xf32>
    %37 = arith.select %0, %35, %36 : vector<8x1xf32>
    %c0_25 = arith.constant 0 : index
    %c0_26 = arith.constant 0 : index
    %38 = vector.load %arg8[%c0_25, %c0_26] : memref<8x32xf32, #tpu.memory_space<vmem>>, vector<8x8xf32>
    %39 = vector.broadcast %17 : vector<8x1xf32> to vector<8x8xf32>
    %40 = arith.mulf %39, %38 : vector<8x8xf32>
    %41 = arith.addf %40, %34 : vector<8x8xf32>
    %42 = vector.broadcast %37 : vector<8x1xf32> to vector<8x8xf32>
    %43 = arith.mulf %41, %42 : vector<8x8xf32>
    %c0_27 = arith.constant 0 : index
    %c0_28 = arith.constant 0 : index
    %44 = vector.load %arg8[%c0_27, %c0_28] : memref<8x32xf32, #tpu.memory_space<vmem>>, vector<8x8xf32>
    tpu.vector_store %arg8[%c0_27, %c0_28], %43 {strides = array<i32>} : memref<8x32xf32, #tpu.memory_space<vmem>>, vector<8x8xf32>,
    %c0_29 = arith.constant 0 : index
    %c0_30 = arith.constant 0 : index
    %c8 = arith.constant 8 : index
    %45 = vector.load %arg3[%c0_29, %c0_30, %c8] : memref<1x8x32xbf16, #tpu.memory_space<vmem>>, vector<1x8x8xbf16>
    %46 = vector.shape_cast %45 : vector<1x8x8xbf16> to vector<8x8xbf16>
    %c0_31 = arith.constant 0 : index
    %c0_32 = arith.constant 0 : index
    %c8_33 = arith.constant 8 : index
    %47 = vector.load %arg4[%c0_31, %c0_32, %c8_33] : memref<1x8x64xbf16, #tpu.memory_space<vmem>>, vector<1x8x8xbf16>
    %48 = vector.shape_cast %47 : vector<1x8x8xbf16> to vector<8x8xbf16>
    %c0_34 = arith.constant 0 : index
    %c0_35 = arith.constant 0 : index
    %c40 = arith.constant 40 : index
    %49 = vector.load %arg4[%c0_34, %c0_35, %c40] : memref<1x8x64xbf16, #tpu.memory_space<vmem>>, vector<1x8x8xbf16>
    %50 = vector.shape_cast %49 : vector<1x8x8xbf16> to vector<8x8xbf16>
    %cst_36 = arith.constant dense<0.000000e+00> : vector<8x8xf32>
    %51 = tpu.matmul %46, %48, %cst_36 {dimension_numbers = #tpu.dot_dimension_numbers<[1], [1], [0], [0], [0, 0, 1, 0], [], []>} : vector<8x8xbf16>, vector<8x8xbf16>, vector<8x8xf32> -> vector<8x8xf32>
    %c1 = arith.constant 1 : index
    %c0_37 = arith.constant 0 : index
    %c0_38 = arith.constant 0 : index
    %52 = vector.load %arg6[%c1, %c0_37, %c0_38] : memref<4x8x1xf32, #tpu.memory_space<vmem>>, vector<1x8x1xf32>
    %53 = vector.shape_cast %52 : vector<1x8x1xf32> to vector<8x1xf32>
    %cst_39 = arith.constant dense<0xFF800000> : vector<8xf32>
    %54 = vector.multi_reduction <maximumf>, %51, %cst_39 [1] : vector<8x8xf32> to vector<8xf32>
    %55 = vector.shape_cast %54 : vector<8xf32> to vector<8x1xf32>
    %56 = arith.maximumf %53, %55 : vector<8x1xf32>
    %57 = arith.subf %53, %56 : vector<8x1xf32>
    %58 = math.exp %57 : vector<8x1xf32>
    %59 = vector.broadcast %56 : vector<8x1xf32> to vector<8x8xf32>
    %60 = arith.subf %51, %59 : vector<8x8xf32>
    %61 = math.exp %60 : vector<8x8xf32>
    %c1_40 = arith.constant 1 : index
    %c0_41 = arith.constant 0 : index
    %c0_42 = arith.constant 0 : index
    %62 = vector.load %arg7[%c1_40, %c0_41, %c0_42] : memref<4x8x1xf32, #tpu.memory_space<vmem>>, vector<1x8x1xf32>
    %63 = vector.shape_cast %62 : vector<1x8x1xf32> to vector<8x1xf32>
    %64 = arith.mulf %58, %63 : vector<8x1xf32>
    %cst_43 = arith.constant dense<0.000000e+00> : vector<8xf32>
    %65 = vector.multi_reduction <add>, %61, %cst_43 [1] : vector<8x8xf32> to vector<8xf32>
    %66 = vector.shape_cast %65 : vector<8xf32> to vector<8x1xf32>
    %67 = arith.addf %64, %66 : vector<8x1xf32>
    %c1_44 = arith.constant 1 : index
    %c0_45 = arith.constant 0 : index
    %c0_46 = arith.constant 0 : index
    %68 = vector.load %arg6[%c1_44, %c0_45, %c0_46] : memref<4x8x1xf32, #tpu.memory_space<vmem>>, vector<1x8x1xf32>
    %69 = vector.shape_cast %68 : vector<1x8x1xf32> to vector<8x1xf32>
    %70 = vector.shape_cast %56 : vector<8x1xf32> to vector<1x8x1xf32>
    tpu.vector_store %arg6[%c1_44, %c0_45, %c0_46], %70 {strides = array<i32>} : memref<4x8x1xf32, #tpu.memory_space<vmem>>, vector<1x8x1xf32>,
    %c1_47 = arith.constant 1 : index
    %c0_48 = arith.constant 0 : index
    %c0_49 = arith.constant 0 : index
    %71 = vector.load %arg7[%c1_47, %c0_48, %c0_49] : memref<4x8x1xf32, #tpu.memory_space<vmem>>, vector<1x8x1xf32>
    %72 = vector.shape_cast %71 : vector<1x8x1xf32> to vector<8x1xf32>
    %73 = vector.shape_cast %67 : vector<8x1xf32> to vector<1x8x1xf32>
    tpu.vector_store %arg7[%c1_47, %c0_48, %c0_49], %73 {strides = array<i32>} : memref<4x8x1xf32, #tpu.memory_space<vmem>>, vector<1x8x1xf32>,
    %74 = arith.truncf %61 : vector<8x8xf32> to vector<8x8xbf16>
    %cst_50 = arith.constant dense<0.000000e+00> : vector<8x8xf32>
    %75 = tpu.matmul %74, %50, %cst_50 {dimension_numbers = #tpu.dot_dimension_numbers<[1], [0], [0], [1], [0, 0, 1, 1], [], []>} : vector<8x8xbf16>, vector<8x8xbf16>, vector<8x8xf32> -> vector<8x8xf32>
    %76 = tpu.reciprocal %67 {approx = true} : vector<8x1xf32> -> vector<8x1xf32>
    %cst_51 = arith.constant 1.000000e+00 : f32
    %77 = vector.broadcast %cst_51 : f32 to vector<8x1xf32>
    %78 = arith.select %0, %76, %77 : vector<8x1xf32>
    %c0_52 = arith.constant 0 : index
    %c8_53 = arith.constant 8 : index
    %79 = vector.load %arg8[%c0_52, %c8_53] : memref<8x32xf32, #tpu.memory_space<vmem>>, vector<8x8xf32>
    %80 = vector.broadcast %58 : vector<8x1xf32> to vector<8x8xf32>
    %81 = arith.mulf %80, %79 : vector<8x8xf32>
    %82 = arith.addf %81, %75 : vector<8x8xf32>
    %83 = vector.broadcast %78 : vector<8x1xf32> to vector<8x8xf32>
    %84 = arith.mulf %82, %83 : vector<8x8xf32>
    %c0_54 = arith.constant 0 : index
    %c8_55 = arith.constant 8 : index
    %85 = vector.load %arg8[%c0_54, %c8_55] : memref<8x32xf32, #tpu.memory_space<vmem>>, vector<8x8xf32>
    tpu.vector_store %arg8[%c0_54, %c8_55], %84 {strides = array<i32>} : memref<8x32xf32, #tpu.memory_space<vmem>>, vector<8x8xf32>,
    %c0_56 = arith.constant 0 : index
    %c0_57 = arith.constant 0 : index
    %c16 = arith.constant 16 : index
    %86 = vector.load %arg3[%c0_56, %c0_57, %c16] : memref<1x8x32xbf16, #tpu.memory_space<vmem>>, vector<1x8x8xbf16>
    %87 = vector.shape_cast %86 : vector<1x8x8xbf16> to vector<8x8xbf16>
    %c0_58 = arith.constant 0 : index
    %c0_59 = arith.constant 0 : index
    %c16_60 = arith.constant 16 : index
    %88 = vector.load %arg4[%c0_58, %c0_59, %c16_60] : memref<1x8x64xbf16, #tpu.memory_space<vmem>>, vector<1x8x8xbf16>
    %89 = vector.shape_cast %88 : vector<1x8x8xbf16> to vector<8x8xbf16>
    %c0_61 = arith.constant 0 : index
    %c0_62 = arith.constant 0 : index
    %c48 = arith.constant 48 : index
    %90 = vector.load %arg4[%c0_61, %c0_62, %c48] : memref<1x8x64xbf16, #tpu.memory_space<vmem>>, vector<1x8x8xbf16>
    %91 = vector.shape_cast %90 : vector<1x8x8xbf16> to vector<8x8xbf16>
    %cst_63 = arith.constant dense<0.000000e+00> : vector<8x8xf32>
    %92 = tpu.matmul %87, %89, %cst_63 {dimension_numbers = #tpu.dot_dimension_numbers<[1], [1], [0], [0], [0, 0, 1, 0], [], []>} : vector<8x8xbf16>, vector<8x8xbf16>, vector<8x8xf32> -> vector<8x8xf32>
    %c2 = arith.constant 2 : index
    %c0_64 = arith.constant 0 : index
    %c0_65 = arith.constant 0 : index
    %93 = vector.load %arg6[%c2, %c0_64, %c0_65] : memref<4x8x1xf32, #tpu.memory_space<vmem>>, vector<1x8x1xf32>
    %94 = vector.shape_cast %93 : vector<1x8x1xf32> to vector<8x1xf32>
    %cst_66 = arith.constant dense<0xFF800000> : vector<8xf32>
    %95 = vector.multi_reduction <maximumf>, %92, %cst_66 [1] : vector<8x8xf32> to vector<8xf32>
    %96 = vector.shape_cast %95 : vector<8xf32> to vector<8x1xf32>
    %97 = arith.maximumf %94, %96 : vector<8x1xf32>
    %98 = arith.subf %94, %97 : vector<8x1xf32>
    %99 = math.exp %98 : vector<8x1xf32>
    %100 = vector.broadcast %97 : vector<8x1xf32> to vector<8x8xf32>
    %101 = arith.subf %92, %100 : vector<8x8xf32>
    %102 = math.exp %101 : vector<8x8xf32>
    %c2_67 = arith.constant 2 : index
    %c0_68 = arith.constant 0 : index
    %c0_69 = arith.constant 0 : index
    %103 = vector.load %arg7[%c2_67, %c0_68, %c0_69] : memref<4x8x1xf32, #tpu.memory_space<vmem>>, vector<1x8x1xf32>
    %104 = vector.shape_cast %103 : vector<1x8x1xf32> to vector<8x1xf32>
    %105 = arith.mulf %99, %104 : vector<8x1xf32>
    %cst_70 = arith.constant dense<0.000000e+00> : vector<8xf32>
    %106 = vector.multi_reduction <add>, %102, %cst_70 [1] : vector<8x8xf32> to vector<8xf32>
    %107 = vector.shape_cast %106 : vector<8xf32> to vector<8x1xf32>
    %108 = arith.addf %105, %107 : vector<8x1xf32>
    %c2_71 = arith.constant 2 : index
    %c0_72 = arith.constant 0 : index
    %c0_73 = arith.constant 0 : index
    %109 = vector.load %arg6[%c2_71, %c0_72, %c0_73] : memref<4x8x1xf32, #tpu.memory_space<vmem>>, vector<1x8x1xf32>
    %110 = vector.shape_cast %109 : vector<1x8x1xf32> to vector<8x1xf32>
    %111 = vector.shape_cast %97 : vector<8x1xf32> to vector<1x8x1xf32>
    tpu.vector_store %arg6[%c2_71, %c0_72, %c0_73], %111 {strides = array<i32>} : memref<4x8x1xf32, #tpu.memory_space<vmem>>, vector<1x8x1xf32>,
    %c2_74 = arith.constant 2 : index
    %c0_75 = arith.constant 0 : index
    %c0_76 = arith.constant 0 : index
    %112 = vector.load %arg7[%c2_74, %c0_75, %c0_76] : memref<4x8x1xf32, #tpu.memory_space<vmem>>, vector<1x8x1xf32>
    %113 = vector.shape_cast %112 : vector<1x8x1xf32> to vector<8x1xf32>
    %114 = vector.shape_cast %108 : vector<8x1xf32> to vector<1x8x1xf32>
    tpu.vector_store %arg7[%c2_74, %c0_75, %c0_76], %114 {strides = array<i32>} : memref<4x8x1xf32, #tpu.memory_space<vmem>>, vector<1x8x1xf32>,
    %115 = arith.truncf %102 : vector<8x8xf32> to vector<8x8xbf16>
    %cst_77 = arith.constant dense<0.000000e+00> : vector<8x8xf32>
    %116 = tpu.matmul %115, %91, %cst_77 {dimension_numbers = #tpu.dot_dimension_numbers<[1], [0], [0], [1], [0, 0, 1, 1], [], []>} : vector<8x8xbf16>, vector<8x8xbf16>, vector<8x8xf32> -> vector<8x8xf32>
    %117 = tpu.reciprocal %108 {approx = true} : vector<8x1xf32> -> vector<8x1xf32>
    %cst_78 = arith.constant 1.000000e+00 : f32
    %118 = vector.broadcast %cst_78 : f32 to vector<8x1xf32>
    %119 = arith.select %0, %117, %118 : vector<8x1xf32>
    %c0_79 = arith.constant 0 : index
    %c16_80 = arith.constant 16 : index
    %120 = vector.load %arg8[%c0_79, %c16_80] : memref<8x32xf32, #tpu.memory_space<vmem>>, vector<8x8xf32>
    %121 = vector.broadcast %99 : vector<8x1xf32> to vector<8x8xf32>
    %122 = arith.mulf %121, %120 : vector<8x8xf32>
    %123 = arith.addf %122, %116 : vector<8x8xf32>
    %124 = vector.broadcast %119 : vector<8x1xf32> to vector<8x8xf32>
    %125 = arith.mulf %123, %124 : vector<8x8xf32>
    %c0_81 = arith.constant 0 : index
    %c16_82 = arith.constant 16 : index
    %126 = vector.load %arg8[%c0_81, %c16_82] : memref<8x32xf32, #tpu.memory_space<vmem>>, vector<8x8xf32>
    tpu.vector_store %arg8[%c0_81, %c16_82], %125 {strides = array<i32>} : memref<8x32xf32, #tpu.memory_space<vmem>>, vector<8x8xf32>,
    %c0_83 = arith.constant 0 : index
    %c0_84 = arith.constant 0 : index
    %c24 = arith.constant 24 : index
    %127 = vector.load %arg3[%c0_83, %c0_84, %c24] : memref<1x8x32xbf16, #tpu.memory_space<vmem>>, vector<1x8x8xbf16>
    %128 = vector.shape_cast %127 : vector<1x8x8xbf16> to vector<8x8xbf16>
    %c0_85 = arith.constant 0 : index
    %c0_86 = arith.constant 0 : index
    %c24_87 = arith.constant 24 : index
    %129 = vector.load %arg4[%c0_85, %c0_86, %c24_87] : memref<1x8x64xbf16, #tpu.memory_space<vmem>>, vector<1x8x8xbf16>
    %130 = vector.shape_cast %129 : vector<1x8x8xbf16> to vector<8x8xbf16>
    %c0_88 = arith.constant 0 : index
    %c0_89 = arith.constant 0 : index
    %c56 = arith.constant 56 : index
    %131 = vector.load %arg4[%c0_88, %c0_89, %c56] : memref<1x8x64xbf16, #tpu.memory_space<vmem>>, vector<1x8x8xbf16>
    %132 = vector.shape_cast %131 : vector<1x8x8xbf16> to vector<8x8xbf16>
    %cst_90 = arith.constant dense<0.000000e+00> : vector<8x8xf32>
    %133 = tpu.matmul %128, %130, %cst_90 {dimension_numbers = #tpu.dot_dimension_numbers<[1], [1], [0], [0], [0, 0, 1, 0], [], []>} : vector<8x8xbf16>, vector<8x8xbf16>, vector<8x8xf32> -> vector<8x8xf32>
    %c3 = arith.constant 3 : index
    %c0_91 = arith.constant 0 : index
    %c0_92 = arith.constant 0 : index
    %134 = vector.load %arg6[%c3, %c0_91, %c0_92] : memref<4x8x1xf32, #tpu.memory_space<vmem>>, vector<1x8x1xf32>
    %135 = vector.shape_cast %134 : vector<1x8x1xf32> to vector<8x1xf32>
    %cst_93 = arith.constant dense<0xFF800000> : vector<8xf32>
    %136 = vector.multi_reduction <maximumf>, %133, %cst_93 [1] : vector<8x8xf32> to vector<8xf32>
    %137 = vector.shape_cast %136 : vector<8xf32> to vector<8x1xf32>
    %138 = arith.maximumf %135, %137 : vector<8x1xf32>
    %139 = arith.subf %135, %138 : vector<8x1xf32>
    %140 = math.exp %139 : vector<8x1xf32>
    %141 = vector.broadcast %138 : vector<8x1xf32> to vector<8x8xf32>
    %142 = arith.subf %133, %141 : vector<8x8xf32>
    %143 = math.exp %142 : vector<8x8xf32>
    %c3_94 = arith.constant 3 : index
    %c0_95 = arith.constant 0 : index
    %c0_96 = arith.constant 0 : index
    %144 = vector.load %arg7[%c3_94, %c0_95, %c0_96] : memref<4x8x1xf32, #tpu.memory_space<vmem>>, vector<1x8x1xf32>
    %145 = vector.shape_cast %144 : vector<1x8x1xf32> to vector<8x1xf32>
    %146 = arith.mulf %140, %145 : vector<8x1xf32>
    %cst_97 = arith.constant dense<0.000000e+00> : vector<8xf32>
    %147 = vector.multi_reduction <add>, %143, %cst_97 [1] : vector<8x8xf32> to vector<8xf32>
    %148 = vector.shape_cast %147 : vector<8xf32> to vector<8x1xf32>
    %149 = arith.addf %146, %148 : vector<8x1xf32>
    %c3_98 = arith.constant 3 : index
    %c0_99 = arith.constant 0 : index
    %c0_100 = arith.constant 0 : index
    %150 = vector.load %arg6[%c3_98, %c0_99, %c0_100] : memref<4x8x1xf32, #tpu.memory_space<vmem>>, vector<1x8x1xf32>
    %151 = vector.shape_cast %150 : vector<1x8x1xf32> to vector<8x1xf32>
    %152 = vector.shape_cast %138 : vector<8x1xf32> to vector<1x8x1xf32>
    tpu.vector_store %arg6[%c3_98, %c0_99, %c0_100], %152 {strides = array<i32>} : memref<4x8x1xf32, #tpu.memory_space<vmem>>, vector<1x8x1xf32>,
    %c3_101 = arith.constant 3 : index
    %c0_102 = arith.constant 0 : index
    %c0_103 = arith.constant 0 : index
    %153 = vector.load %arg7[%c3_101, %c0_102, %c0_103] : memref<4x8x1xf32, #tpu.memory_space<vmem>>, vector<1x8x1xf32>
    %154 = vector.shape_cast %153 : vector<1x8x1xf32> to vector<8x1xf32>
    %155 = vector.shape_cast %149 : vector<8x1xf32> to vector<1x8x1xf32>
    tpu.vector_store %arg7[%c3_101, %c0_102, %c0_103], %155 {strides = array<i32>} : memref<4x8x1xf32, #tpu.memory_space<vmem>>, vector<1x8x1xf32>,
    %156 = arith.truncf %143 : vector<8x8xf32> to vector<8x8xbf16>
    %cst_104 = arith.constant dense<0.000000e+00> : vector<8x8xf32>
    %157 = tpu.matmul %156, %132, %cst_104 {dimension_numbers = #tpu.dot_dimension_numbers<[1], [0], [0], [1], [0, 0, 1, 1], [], []>} : vector<8x8xbf16>, vector<8x8xbf16>, vector<8x8xf32> -> vector<8x8xf32>
    %158 = tpu.reciprocal %149 {approx = true} : vector<8x1xf32> -> vector<8x1xf32>
    %cst_105 = arith.constant 1.000000e+00 : f32
    %159 = vector.broadcast %cst_105 : f32 to vector<8x1xf32>
    %160 = arith.select %0, %158, %159 : vector<8x1xf32>
    %c0_106 = arith.constant 0 : index
    %c24_107 = arith.constant 24 : index
    %161 = vector.load %arg8[%c0_106, %c24_107] : memref<8x32xf32, #tpu.memory_space<vmem>>, vector<8x8xf32>
    %162 = vector.broadcast %140 : vector<8x1xf32> to vector<8x8xf32>
    %163 = arith.mulf %162, %161 : vector<8x8xf32>
    %164 = arith.addf %163, %157 : vector<8x8xf32>
    %165 = vector.broadcast %160 : vector<8x1xf32> to vector<8x8xf32>
    %166 = arith.mulf %164, %165 : vector<8x8xf32>
    %c0_108 = arith.constant 0 : index
    %c24_109 = arith.constant 24 : index
    %167 = vector.load %arg8[%c0_108, %c24_109] : memref<8x32xf32, #tpu.memory_space<vmem>>, vector<8x8xf32>
    tpu.vector_store %arg8[%c0_108, %c24_109], %166 {strides = array<i32>} : memref<8x32xf32, #tpu.memory_space<vmem>>, vector<8x8xf32>,
    %168 = arith.extui %0 : i1 to i32
    %c0_i32_110 = arith.constant 0 : i32
    %169 = arith.cmpi ne, %168, %c0_i32_110 : i32
    scf.if %169 {
      %c0_111 = arith.constant 0 : index
      %c0_112 = arith.constant 0 : index
      %170 = vector.load %arg8[%c0_111, %c0_112] : memref<8x32xf32, #tpu.memory_space<vmem>>, vector<8x32xf32>
      %171 = arith.truncf %170 : vector<8x32xf32> to vector<8x32xbf16>
      %c0_113 = arith.constant 0 : index
      %c0_114 = arith.constant 0 : index
      %c0_115 = arith.constant 0 : index
      %172 = vector.load %arg5[%c0_113, %c0_114, %c0_115] : memref<1x8x32xbf16, #tpu.memory_space<vmem>>, vector<1x8x32xbf16>
      %173 = vector.shape_cast %172 : vector<1x8x32xbf16> to vector<8x32xbf16>
      %174 = vector.shape_cast %171 : vector<8x32xbf16> to vector<1x8x32xbf16>
      tpu.vector_store %arg5[%c0_113, %c0_114, %c0_115], %174 {strides = array<i32>} : memref<1x8x32xbf16, #tpu.memory_space<vmem>>, vector<1x8x32xbf16>,
    } else {
    }
    return
  }
  func.func @transform_0(%arg0: i32, %arg1: i32, %arg2: i32) -> (i32, i32, i32) {
    %c0_i32 = arith.constant 0 : i32
    %c0_i32_0 = arith.constant 0 : i32
    return %arg0, %arg1, %c0_i32 : i32, i32, i32
  }
  func.func @transform_1(%arg0: i32, %arg1: i32, %arg2: i32) -> (i32, i32, i32) {
    %c0_i32 = arith.constant 0 : i32
    %c0_i32_0 = arith.constant 0 : i32
    return %arg0, %arg2, %c0_i32 : i32, i32, i32
  }
  func.func @transform_2(%arg0: i32, %arg1: i32, %arg2: i32) -> (i32, i32, i32) {
    %c0_i32 = arith.constant 0 : i32
    %c0_i32_0 = arith.constant 0 : i32
    return %arg0, %arg1, %c0_i32 : i32, i32, i32
  }
}

module attributes {stable_mosaic.version = 11 : i64} {
  func.func @_post_attn_ffn_kernel(%arg0: i32, %arg1: i32, %arg2: memref<16x32xbf16, #tpu.memory_space<vmem>>, %arg3: memref<16x32xf32, #tpu.memory_space<vmem>>, %arg4: memref<32x32xbf16, #tpu.memory_space<vmem>>, %arg5: memref<1x32xf32, #tpu.memory_space<vmem>>, %arg6: memref<1x32xf32, #tpu.memory_space<vmem>>, %arg7: memref<1x32xf32, #tpu.memory_space<vmem>>, %arg8: memref<32x128xbf16, #tpu.memory_space<vmem>>, %arg9: memref<1x128xf32, #tpu.memory_space<vmem>>, %arg10: memref<128x32xbf16, #tpu.memory_space<vmem>>, %arg11: memref<1x32xf32, #tpu.memory_space<vmem>>, %arg12: memref<16x32xf32, #tpu.memory_space<vmem>>, %arg13: memref<16x32xf32, #tpu.memory_space<vmem>>, %arg14: memref<16x32xbf16, #tpu.memory_space<vmem>>, %arg15: memref<16x32xf32, #tpu.memory_space<vmem>>) attributes {dimension_semantics = [#tpu.dimension_semantics<parallel>, #tpu.dimension_semantics<arbitrary>], iteration_bounds = array<i64: 1, 1>, scalar_prefetch = 0 : i64, scratch_operands = 3 : i64, tpu.core_type = #tpu.core_type<tc>, window_params = [{transform_indices = @transform_0, window_bounds = array<i64: 16, 32>}, {transform_indices = @transform_1, window_bounds = array<i64: 16, 32>}, {pipeline_mode = #tpu.pipeline_mode<synchronous>, transform_indices = @transform_2, window_bounds = array<i64: 32, 32>}, {pipeline_mode = #tpu.pipeline_mode<synchronous>, transform_indices = @transform_3, window_bounds = array<i64: 1, 32>}, {pipeline_mode = #tpu.pipeline_mode<synchronous>, transform_indices = @transform_4, window_bounds = array<i64: 1, 32>}, {pipeline_mode = #tpu.pipeline_mode<synchronous>, transform_indices = @transform_5, window_bounds = array<i64: 1, 32>}, {transform_indices = @transform_6, window_bounds = array<i64: 32, 128>}, {transform_indices = @transform_7, window_bounds = array<i64: 1, 128>}, {transform_indices = @transform_8, window_bounds = array<i64: 128, 32>}, {pipeline_mode = #tpu.pipeline_mode<synchronous>, transform_indices = @transform_9, window_bounds = array<i64: 1, 32>}, {transform_indices = @transform_10, window_bounds = array<i64: 16, 32>}]} {
    %c0_i32 = arith.constant 0 : i32
    %0 = arith.cmpi eq, %arg1, %c0_i32 : i32
    %1 = arith.extui %0 : i1 to i32
    %c0_i32_0 = arith.constant 0 : i32
    %2 = arith.cmpi ne, %1, %c0_i32_0 : i32
    scf.if %2 {
      %c0_16 = arith.constant 0 : index
      %c0_17 = arith.constant 0 : index
      %20 = vector.load %arg2[%c0_16, %c0_17] : memref<16x32xbf16, #tpu.memory_space<vmem>>, vector<16x32xbf16>
      %c0_18 = arith.constant 0 : index
      %c0_19 = arith.constant 0 : index
      %21 = vector.load %arg4[%c0_18, %c0_19] : memref<32x32xbf16, #tpu.memory_space<vmem>>, vector<32x32xbf16>
      %cst_20 = arith.constant dense<0.000000e+00> : vector<16x32xf32>
      %22 = tpu.matmul %20, %21, %cst_20 {dimension_numbers = #tpu.dot_dimension_numbers<[1], [0], [0], [1], [0, 0, 1, 1], [], []>} : vector<16x32xbf16>, vector<32x32xbf16>, vector<16x32xf32> -> vector<16x32xf32>
      %c0_21 = arith.constant 0 : index
      %c0_22 = arith.constant 0 : index
      %23 = vector.load %arg5[%c0_21, %c0_22] : memref<1x32xf32, #tpu.memory_space<vmem>>, vector<1x32xf32>
      %24 = vector.broadcast %23 : vector<1x32xf32> to vector<16x32xf32>
      %25 = arith.addf %22, %24 : vector<16x32xf32>
      %c0_23 = arith.constant 0 : index
      %c0_24 = arith.constant 0 : index
      %26 = vector.load %arg3[%c0_23, %c0_24] : memref<16x32xf32, #tpu.memory_space<vmem>>, vector<16x32xf32>
      %27 = arith.addf %25, %26 : vector<16x32xf32>
      %c0_25 = arith.constant 0 : index
      %c0_26 = arith.constant 0 : index
      %28 = vector.load %arg13[%c0_25, %c0_26] : memref<16x32xf32, #tpu.memory_space<vmem>>, vector<16x32xf32>
      tpu.vector_store %arg13[%c0_25, %c0_26], %27 {strides = array<i32>} : memref<16x32xf32, #tpu.memory_space<vmem>>, vector<16x32xf32>,
      %cst_27 = arith.constant dense<0.000000e+00> : vector<16xf32>
      %29 = vector.multi_reduction <add>, %27, %cst_27 [1] : vector<16x32xf32> to vector<16xf32>
      %30 = vector.shape_cast %29 : vector<16xf32> to vector<16x1xf32>
      %cst_28 = arith.constant 3.200000e+01 : f32
      %31 = vector.broadcast %cst_28 : f32 to vector<16x1xf32>
      %32 = arith.divf %30, %31 : vector<16x1xf32>
      %33 = vector.broadcast %32 : vector<16x1xf32> to vector<16x32xf32>
      %34 = arith.subf %27, %33 : vector<16x32xf32>
      %35 = arith.mulf %34, %34 : vector<16x32xf32>
      %cst_29 = arith.constant dense<0.000000e+00> : vector<16xf32>
      %36 = vector.multi_reduction <add>, %35, %cst_29 [1] : vector<16x32xf32> to vector<16xf32>
      %37 = vector.shape_cast %36 : vector<16xf32> to vector<16x1xf32>
      %cst_30 = arith.constant 3.200000e+01 : f32
      %38 = vector.broadcast %cst_30 : f32 to vector<16x1xf32>
      %39 = arith.divf %37, %38 : vector<16x1xf32>
      %cst_31 = arith.constant 9.99999996E-13 : f32
      %40 = vector.broadcast %cst_31 : f32 to vector<16x1xf32>
      %41 = arith.addf %39, %40 : vector<16x1xf32>
      %42 = math.rsqrt %41 : vector<16x1xf32>
      %43 = vector.broadcast %42 : vector<16x1xf32> to vector<16x32xf32>
      %44 = arith.mulf %34, %43 : vector<16x32xf32>
      %c0_32 = arith.constant 0 : index
      %c0_33 = arith.constant 0 : index
      %45 = vector.load %arg6[%c0_32, %c0_33] : memref<1x32xf32, #tpu.memory_space<vmem>>, vector<1x32xf32>
      %46 = vector.broadcast %45 : vector<1x32xf32> to vector<16x32xf32>
      %47 = arith.mulf %46, %44 : vector<16x32xf32>
      %c0_34 = arith.constant 0 : index
      %c0_35 = arith.constant 0 : index
      %48 = vector.load %arg7[%c0_34, %c0_35] : memref<1x32xf32, #tpu.memory_space<vmem>>, vector<1x32xf32>
      %49 = vector.broadcast %48 : vector<1x32xf32> to vector<16x32xf32>
      %50 = arith.addf %47, %49 : vector<16x32xf32>
      %51 = arith.truncf %50 : vector<16x32xf32> to vector<16x32xbf16>
      %c0_36 = arith.constant 0 : index
      %c0_37 = arith.constant 0 : index
      %52 = vector.load %arg14[%c0_36, %c0_37] : memref<16x32xbf16, #tpu.memory_space<vmem>>, vector<16x32xbf16>
      tpu.vector_store %arg14[%c0_36, %c0_37], %51 {strides = array<i32>} : memref<16x32xbf16, #tpu.memory_space<vmem>>, vector<16x32xbf16>,
      %cst_38 = arith.constant 0.000000e+00 : f32
      %53 = vector.broadcast %cst_38 : f32 to vector<16x32xf32>
      %c0_39 = arith.constant 0 : index
      %c0_40 = arith.constant 0 : index
      %54 = vector.load %arg15[%c0_39, %c0_40] : memref<16x32xf32, #tpu.memory_space<vmem>>, vector<16x32xf32>
      tpu.vector_store %arg15[%c0_39, %c0_40], %53 {strides = array<i32>} : memref<16x32xf32, #tpu.memory_space<vmem>>, vector<16x32xf32>,
    } else {
    }
    %c0 = arith.constant 0 : index
    %c0_1 = arith.constant 0 : index
    %3 = vector.load %arg14[%c0, %c0_1] : memref<16x32xbf16, #tpu.memory_space<vmem>>, vector<16x32xbf16>
    %c0_2 = arith.constant 0 : index
    %c0_3 = arith.constant 0 : index
    %4 = vector.load %arg8[%c0_2, %c0_3] : memref<32x128xbf16, #tpu.memory_space<vmem>>, vector<32x128xbf16>
    %cst = arith.constant dense<0.000000e+00> : vector<16x128xf32>
    %5 = tpu.matmul %3, %4, %cst {dimension_numbers = #tpu.dot_dimension_numbers<[1], [0], [0], [1], [0, 0, 1, 1], [], []>} : vector<16x32xbf16>, vector<32x128xbf16>, vector<16x128xf32> -> vector<16x128xf32>
    %c0_4 = arith.constant 0 : index
    %c0_5 = arith.constant 0 : index
    %6 = vector.load %arg9[%c0_4, %c0_5] : memref<1x128xf32, #tpu.memory_space<vmem>>, vector<1x128xf32>
    %7 = vector.broadcast %6 : vector<1x128xf32> to vector<16x128xf32>
    %8 = arith.addf %5, %7 : vector<16x128xf32>
    %cst_6 = arith.constant 0.000000e+00 : f32
    %9 = vector.broadcast %cst_6 : f32 to vector<16x128xf32>
    %10 = arith.maximumf %8, %9 : vector<16x128xf32>
    %c0_7 = arith.constant 0 : index
    %c0_8 = arith.constant 0 : index
    %11 = vector.load %arg15[%c0_7, %c0_8] : memref<16x32xf32, #tpu.memory_space<vmem>>, vector<16x32xf32>
    %12 = arith.truncf %10 : vector<16x128xf32> to vector<16x128xbf16>
    %c0_9 = arith.constant 0 : index
    %c0_10 = arith.constant 0 : index
    %13 = vector.load %arg10[%c0_9, %c0_10] : memref<128x32xbf16, #tpu.memory_space<vmem>>, vector<128x32xbf16>
    %cst_11 = arith.constant dense<0.000000e+00> : vector<16x32xf32>
    %14 = tpu.matmul %12, %13, %cst_11 {dimension_numbers = #tpu.dot_dimension_numbers<[1], [0], [0], [1], [0, 0, 1, 1], [], []>} : vector<16x128xbf16>, vector<128x32xbf16>, vector<16x32xf32> -> vector<16x32xf32>
    %15 = arith.addf %11, %14 : vector<16x32xf32>
    %c0_12 = arith.constant 0 : index
    %c0_13 = arith.constant 0 : index
    %16 = vector.load %arg15[%c0_12, %c0_13] : memref<16x32xf32, #tpu.memory_space<vmem>>, vector<16x32xf32>
    tpu.vector_store %arg15[%c0_12, %c0_13], %15 {strides = array<i32>} : memref<16x32xf32, #tpu.memory_space<vmem>>, vector<16x32xf32>,
    %c0_i32_14 = arith.constant 0 : i32
    %17 = arith.cmpi eq, %arg1, %c0_i32_14 : i32
    %18 = arith.extui %17 : i1 to i32
    %c0_i32_15 = arith.constant 0 : i32
    %19 = arith.cmpi ne, %18, %c0_i32_15 : i32
    scf.if %19 {
      %c0_16 = arith.constant 0 : index
      %c0_17 = arith.constant 0 : index
      %20 = vector.load %arg13[%c0_16, %c0_17] : memref<16x32xf32, #tpu.memory_space<vmem>>, vector<16x32xf32>
      %c0_18 = arith.constant 0 : index
      %c0_19 = arith.constant 0 : index
      %21 = vector.load %arg15[%c0_18, %c0_19] : memref<16x32xf32, #tpu.memory_space<vmem>>, vector<16x32xf32>
      %22 = arith.addf %20, %21 : vector<16x32xf32>
      %c0_20 = arith.constant 0 : index
      %c0_21 = arith.constant 0 : index
      %23 = vector.load %arg11[%c0_20, %c0_21] : memref<1x32xf32, #tpu.memory_space<vmem>>, vector<1x32xf32>
      %24 = vector.broadcast %23 : vector<1x32xf32> to vector<16x32xf32>
      %25 = arith.addf %22, %24 : vector<16x32xf32>
      %c0_22 = arith.constant 0 : index
      %c0_23 = arith.constant 0 : index
      %26 = vector.load %arg12[%c0_22, %c0_23] : memref<16x32xf32, #tpu.memory_space<vmem>>, vector<16x32xf32>
      tpu.vector_store %arg12[%c0_22, %c0_23], %25 {strides = array<i32>} : memref<16x32xf32, #tpu.memory_space<vmem>>, vector<16x32xf32>,
    } else {
    }
    return
  }
  func.func @transform_0(%arg0: i32, %arg1: i32) -> (i32, i32) {
    %c0_i32 = arith.constant 0 : i32
    %c0_i32_0 = arith.constant 0 : i32
    return %arg0, %c0_i32 : i32, i32
  }
  func.func @transform_1(%arg0: i32, %arg1: i32) -> (i32, i32) {
    %c0_i32 = arith.constant 0 : i32
    %c0_i32_0 = arith.constant 0 : i32
    return %arg0, %c0_i32 : i32, i32
  }
  func.func @transform_2(%arg0: i32, %arg1: i32) -> (i32, i32) {
    %c0_i32 = arith.constant 0 : i32
    %c0_i32_0 = arith.constant 0 : i32
    %c0_i32_1 = arith.constant 0 : i32
    return %c0_i32, %c0_i32_0 : i32, i32
  }
  func.func @transform_3(%arg0: i32, %arg1: i32) -> (i32, i32) {
    %c0_i32 = arith.constant 0 : i32
    %c0_i32_0 = arith.constant 0 : i32
    %c0_i32_1 = arith.constant 0 : i32
    return %c0_i32, %c0_i32_0 : i32, i32
  }
  func.func @transform_4(%arg0: i32, %arg1: i32) -> (i32, i32) {
    %c0_i32 = arith.constant 0 : i32
    %c0_i32_0 = arith.constant 0 : i32
    %c0_i32_1 = arith.constant 0 : i32
    return %c0_i32, %c0_i32_0 : i32, i32
  }
  func.func @transform_5(%arg0: i32, %arg1: i32) -> (i32, i32) {
    %c0_i32 = arith.constant 0 : i32
    %c0_i32_0 = arith.constant 0 : i32
    %c0_i32_1 = arith.constant 0 : i32
    return %c0_i32, %c0_i32_0 : i32, i32
  }
  func.func @transform_6(%arg0: i32, %arg1: i32) -> (i32, i32) {
    %c0_i32 = arith.constant 0 : i32
    %c0_i32_0 = arith.constant 0 : i32
    return %c0_i32, %arg1 : i32, i32
  }
  func.func @transform_7(%arg0: i32, %arg1: i32) -> (i32, i32) {
    %c0_i32 = arith.constant 0 : i32
    %c0_i32_0 = arith.constant 0 : i32
    return %c0_i32, %arg1 : i32, i32
  }
  func.func @transform_8(%arg0: i32, %arg1: i32) -> (i32, i32) {
    %c0_i32 = arith.constant 0 : i32
    %c0_i32_0 = arith.constant 0 : i32
    return %arg1, %c0_i32 : i32, i32
  }
  func.func @transform_9(%arg0: i32, %arg1: i32) -> (i32, i32) {
    %c0_i32 = arith.constant 0 : i32
    %c0_i32_0 = arith.constant 0 : i32
    %c0_i32_1 = arith.constant 0 : i32
    return %c0_i32, %c0_i32_0 : i32, i32
  }
  func.func @transform_10(%arg0: i32, %arg1: i32) -> (i32, i32) {
    %c0_i32 = arith.constant 0 : i32
    %c0_i32_0 = arith.constant 0 : i32
    return %arg0, %c0_i32 : i32, i32
  }
}

</mosaic_0001>

<bundles_post_ra>
// kernel: transformer_encoder_layer.3
= control target key start
LH: loop header
LB: loop body
LE: loop exit
PB: predicated region body
PF: predicated region fallthrough
CT: control target
= control target key end

     0   :  { %vm25_vm0 = vcmask 261120   ;;  %v177_v4 = vmov 32.0   ;;  %vm131_vm8 = vcmask 257024   ;;  %vm144_vm9 = vcmask 519168   ;;  %s252_s0 = inlined_call_operand.vmem [shape: f32[16,32], index: 0, kind: input, shape index: {}]   ;;  %s253_s1 = inlined_call_operand.vmem [shape: f32[1,32], index: 1, kind: input, shape index: {}]   ;;  %s254_s2 = inlined_call_operand.vmem [shape: f32[1,32], index: 2, kind: input, shape index: {}]   ;;  %s255_s4 = inlined_call_operand.vmem [shape: f32[1,96], index: 4, kind: input, shape index: {}]   ;;  %s256_s3 = inlined_call_operand.vmem [shape: bf16[32,96], index: 3, kind: input, shape index: {}]   ;;  %s257_s5 = inlined_call_operand.vmem [shape: bf16[16,32], index: 5, kind: output, shape index: {0}]   ;;  %s258_s6 = inlined_call_operand.vmem [shape: bf16[16,64], index: 6, kind: output, shape index: {1}]  }
   0x1   :  { %v23_v0 = vld [vmem:[%s252_s0] sm:$0xff]  ;;  %v24_v2 = vld [vmem:[%s252_s0 + $0x8] sm:$0xff]  ;;  %171 = vrcp.f32 %v177_v4 }
   0x2   :  { %v26_v1 = vsel %vm25_vm0, %v23_v0, 0.0  ;;  %v29_v3 = vsel %vm25_vm0, %v24_v2, 0.0  ;;  %v165_v21 = vld [vmem:[%s256_s3 + $0x8] sm:$0xff]  ;;  %v164_v23 = vld [vmem:[%s256_s3] sm:$0xff] }
   0x3   :  { %27 = vadd.xlane.f32.xlu0 %v26_v1  ;;  %119 = vmatpush.bf16.msra.mxu0 %v165_v21  ;;  %v168_v42 = vld [vmem:[%s253_s1] ss:$0 sm:$0xff]  ;;  %s178_s1 = smov 96  }
   0x4   :  { %v169_v47 = vld [vmem:[%s254_s2] ss:$0 sm:$0xff] }
   0x5   :  { %v170_v52 = vld [vmem:[%s255_s4] ss:$0 sm:$0xff] }
   0x7   :  { %v172_v5 = vpop.eup %171  ;;  %120 = vmatpush.bf16.msra.mxu0 %v164_v23 }
   0x8   :  { %v33_v6 = vmul.f32 32.0, %v172_v5  ;;  %vm37_vm1 = vweird.f32 %v172_v5 }
   0xa   :  { %v34_v7 = vsub.f32 1.0, %v33_v6 }
   0xb   :  { %30 = vadd.xlane.f32.xlu0 %v29_v3 }
   0xc   :  { %v35_v8 = vmul.f32 %v172_v5, %v34_v7 }
   0xe   :  { %v36_v9 = vadd.f32 %v172_v5, %v35_v8 }
  0x10   :  { %v38_v10 = vsel %vm37_vm1, %v172_v5, %v36_v9 }
  0x76   :  { %v28_v11 = vpop.xlane.xlu0 %27 }
  0x77   :  { %v39_v12 = vmul.f32 %v38_v10, %v28_v11 }
  0x79   :  { %v41_v13 = vsub.f32 %v23_v0, %v39_v12 }
  0x7b   :  { %v43_v14 = vmul.f32 %v41_v13, %v41_v13 }
  0x7d   :  { %v45_v15 = vsel %vm25_vm0, %v43_v14, 0.0 }
  0x7e   :  { %46 = vadd.xlane.f32.xlu1 %v45_v15  ;;  %v31_v16 = vpop.xlane.xlu0 %30 }
  0x7f   :  { %v40_v17 = vmul.f32 %v38_v10, %v31_v16 }
  0x81   :  { %v42_v18 = vsub.f32 %v24_v2, %v40_v17 }
  0x83   :  { %v44_v19 = vmul.f32 %v42_v18, %v42_v18 }
  0x85   :  { %v48_v20 = vsel %vm25_vm0, %v44_v19, 0.0 }
  0x86   :  { %49 = vadd.xlane.f32.xlu1 %v48_v20 }
  0xf1   :  { %v47_v22 = vpop.xlane.xlu1 %46 }
  0xf2   :  { %v51_v24 = vmul.f32 %v47_v22, %v38_v10 }
  0xf4   :  { %v53_v25 = vadd.f32 1e-12, %v51_v24 }
  0xf6   :  { %173 = vrsqrt.f32 %v53_v25  ;;  %vm61_vm3 = vweird.f32 %v53_v25 }
  0xf9   :  { %v50_v26 = vpop.xlane.xlu1 %49 }
  0xfa   :  { %v52_v27 = vmul.f32 %v50_v26, %v38_v10 }
  0xfc   :  { %v174_v28 = vpop.eup %173  ;;  %v54_v29 = vadd.f32 1e-12, %v52_v27 }
  0xfd   :  { %v56_v30 = vmul.f32 %v174_v28, %v53_v25  ;;  %vm62_vm2 = vweird.f32 %v174_v28 }
  0xfe   :  { %175 = vrsqrt.f32 %v54_v29  ;;  %vm63_vm4 = vmor %vm61_vm3, %vm62_vm2  ;;  %vm71_vm6 = vweird.f32 %v54_v29 }
  0xff   :  { %v57_v31 = vmul.f32 %v174_v28, %v56_v30 }
 0x101   :  { %v58_v32 = vmul.f32 0.5, %v57_v31 }
 0x103   :  { %v59_v33 = vsub.f32 1.5, %v58_v32 }
 0x104   :  { %v176_v34 = vpop.eup %175 }
 0x105   :  { %v60_v35 = vmul.f32 %v174_v28, %v59_v33  ;;  %v66_v36 = vmul.f32 %v176_v34, %v54_v29  ;;  %vm72_vm5 = vweird.f32 %v176_v34 }
 0x106   :  { %vm73_vm7 = vmor %vm71_vm6, %vm72_vm5 }
 0x107   :  { %v67_v37 = vmul.f32 %v176_v34, %v66_v36  ;;  %v64_v38 = vsel %vm63_vm4, %v174_v28, %v60_v35 }
 0x108   :  { %v75_v41 = vmul.f32 %v64_v38, %v41_v13 }
 0x109   :  { %v68_v39 = vmul.f32 0.5, %v67_v37 }
 0x10a   :  { %v81_v46 = vmul.f32 %v168_v42, %v75_v41 }
 0x10b   :  { %v69_v40 = vsub.f32 1.5, %v68_v39 }
 0x10c   :  { %v87_v49 = vadd.f32 %v169_v47, %v81_v46 }
 0x10d   :  { %v70_v43 = vmul.f32 %v176_v34, %v69_v40 }
 0x10f   :  { %v74_v44 = vsel %vm73_vm7, %v176_v34, %v70_v43 }
 0x110   :  { %v76_v45 = vmul.f32 %v74_v44, %v42_v18 }
 0x112   :  { %v82_v48 = vmul.f32 %v168_v42, %v76_v45 }
 0x114   :  { %v88_v50 = vadd.f32 %v169_v47, %v82_v48 }
 0x116   :  { %v89_v51 = vpack.c.bf16 %v88_v50, %v87_v49 }
 0x118   :  { %163 = vmatmul.msk.bf16.vlgmr.msra.gmra.mxu0 %vm25_vm0, %v89_v51 }
 0x195   :  { %v122_v53 = vpop.f32.mrf.mxu0 }
 0x196   :  { %v123_v54 = vadd.f32 %v170_v52, %v122_v53 }
 0x198   :  { %v127_v55 = vmul.f32 0.35355338, %v123_v54  ;;  %v134_v56 = vpack.c.bf16 %v123_v54, %v123_v54 }
 0x19a   :  { %v129_v57 = vpack.c.bf16 %v127_v55, %v127_v55  ;;  %138 = vrot.lane.b32.xlu2 %v134_v56, %s178_s1 }
 0x19c   :  { %132 = vst.msk [vmem:[%s257_s5] sm:$0xf] %vm131_vm8, %v129_v57 }
 0x19d   :  { %v124_v58 = vpop.f32.mrf.mxu0 }
 0x19e   :  { %v125_v59 = vadd.f32 %v170_v52, %v124_v58 }
 0x1a0   :  { %v128_v60 = vmul.f32 0.35355338, %v125_v59  ;;  %v135_v61 = vpack.c.bf16 %v125_v59, %v125_v59 }
 0x1a2   :  { %v130_v62 = vpack.c.bf16 %v128_v60, %v128_v60  ;;  %140 = vrot.lane.b32.xlu2 %v135_v61, %s178_s1 }
 0x1a4   :  { %133 = vst.msk [vmem:[%s257_s5 + $0x4] sm:$0xf] %vm131_vm8, %v130_v62 }
 0x1f4   :  { %v139_v63 = vpop.permute.xlu2 %138 }
 0x1f5   :  { %145 = vst.msk [vmem:[%s258_s6] sm:$0xf] %vm144_vm9, %v139_v63 }
 0x1fc   :  { %v141_v0 = vpop.permute.xlu2 %140 }
 0x1fd   :  { %146 = vst.msk [vmem:[%s258_s6 + $0x4] sm:$0xf] %vm144_vm9, %v141_v0 }

// kernel: transformer_encoder_layer.4
= control target key start
LH: loop header
LB: loop body
LE: loop exit
PB: predicated region body
PF: predicated region fallthrough
CT: control target
= control target key end

     0   :  { %s850_s9 = smov 0   ;;  %s852_s10 = smov 0   ;;  %s1018_s0 = inlined_call_operand.vmem [shape: bf16[2,8,32], index: 0, kind: input, shape index: {}]   ;;  %s1019_s1 = inlined_call_operand.vmem [shape: bf16[2,8,64], index: 1, kind: input, shape index: {}]   ;;  %s1020_s2 = inlined_call_operand.vmem [shape: bf16[2,8,32], index: 2, kind: output, shape index: {}]  }
   0x1   :  { %s854_s11 = smov 0  }
   0x2 LB: > { %s31_s12 = sadd.s32 1, %s816_s10  ;;  %p720_p0 = scmp.ge.s32.totalorder %s820_s11, 1  ;;  %s820_s11 = sphi %s854_s11, %s12_s11   ;;  %s816_s10 = sphi %s852_s10, %s1022_s10   ;;  %s812_s9 = sphi %s850_s9, %s1021_s9  }
   0x3   : > { %p33_p1 = scmp.ge.s32.totalorder %s31_s12, 2  ;;  %p151_p2 = scmp.lt.s32.totalorder %s820_s11, 3 }
   0x5   : > { %s1024_s12 = smov (%p33_p1, %s31_s12), 0  ;;  %p152_p3 = pnand %p720_p0, %p151_p2 }
   0x6   : > { %p184_p4 = scmp.lt.s32.totalorder (!%p152_p3), %s812_s9, 1  ;;  %s824_s20 = smov (!%p152_p3), 120  }
   0x7   : > { %155 = sbr.rel (%p152_p3) target bundleno = 1118 (0x45e), region = 28  ;;  %s826_s21 = smov (!%p152_p3), 96  }
   0x8   : > { %s827_s22 = smov (!%p152_p3), 112   ;;  %s828_s23 = smov (!%p152_p3), 104  }
   0x9   : > { %s829_s24 = smov (!%p152_p3), 88   ;;  %s830_s25 = smov (!%p152_p3), 80  }
   0xa   : > { %s831_s26 = smov (!%p152_p3), 72   ;;  %s832_s27 = smov (!%p152_p3), 8  }
   0xb   : > { %s833_s28 = smov (!%p152_p3), 24   ;;  %s834_s29 = smov (!%p152_p3), 16  }
   0xc   : > { %s1026_s9 = smov (!%p184_p4, %s812_s9), 1  ;;  %vm223_vm0 = vcmask 64512   ;;  %vm210_vm1 = vcmask 7168   ;;  %v822_v3 = vmov -inf   ;;  %v823_v10 = vmov 0  }
   0xd   : > { %s868_s13 = sshll.u32 %s1026_s9, 2  ;;  %211 = vst.msk [vmem:[#allocation2] sm:$0xff] %vm210_vm1, %v822_v3  ;;  %771 = vset.pattern.permute.xlu1 %v823_v10  ;;  %772 = vset.pattern.permute.xlu2 %v823_v10  ;;  %v825_v11 = vmov 0.0   ;;  %vm277_vm2 = vcmask 1043456   ;;  %vm219_vm3 = vcmask 261120   ;;  %vm413_vm4 = vcmask 130112  }
   0xe   : > { %s874_s16 = scalar_lea.vmem %s1019_s1, %s868_s13  ;;  %s882_s19 = scalar_lea.vmem %s1018_s0, %s868_s13  ;;  %212 = vst.msk [vmem:[#allocation2 + $0x8] sm:$0xff] %vm210_vm1, %v822_v3  ;;  %773 = vset.pattern.permute.xlu0 %v823_v10  ;;  %vm514_vm5 = vcmask 195712   ;;  %vm615_vm6 = vcmask 261312   ;;  %vm622_vm7 = vcmask 257024  }
   0xf   : > { %v222_v0 = vld [vmem:[%s874_s16] sm:$0xf]  ;;  %213 = vst.msk [vmem:[#allocation2 + $0x10] sm:$0xff] %vm210_vm1, %v822_v3  ;;  %s204_s4 = scalar_lea.vmem %s1020_s2, %s868_s13 }
  0x10   : > { %v228_v1 = vsel %vm223_vm0, %v222_v0, 0  ;;  %v221_v2 = vld [vmem:[%s882_s19] sm:$0xf]  ;;  %214 = vst.msk [vmem:[#allocation2 + $0x18] sm:$0xff] %vm210_vm1, %v822_v3  ;;  %v270_v12 = vunpack.c.l.b16 %v222_v0 }
  0x11   : > { %237 = vmatpush.bf16.xpose.msra.mxu0 %v228_v1  ;;  %v315_v7 = vld [vmem:[%s874_s16] sm:$0xf]  ;;  %215 = vst.msk [vmem:[#allocation3] sm:$0xff] %vm210_vm1, %v825_v11 }
  0x12   : > { %v322_v8 = vunpack.c.l.b16 %v315_v7  ;;  %216 = vst.msk [vmem:[#allocation3 + $0x8] sm:$0xff] %vm210_vm1, %v825_v11  ;;  %v271_v13 = vpack.c.b16 %v270_v12, %v270_v12  ;;  %v416_v14 = vld [vmem:[%s874_s16] sm:$0xf] }
  0x13   : > { %217 = vst.msk [vmem:[#allocation3 + $0x10] sm:$0xff] %vm210_vm1, %v825_v11  ;;  %v423_v15 = vunpack.c.l.b16 %v416_v14  ;;  %v517_v16 = vld [vmem:[%s874_s16] sm:$0xf] }
  0x14   : > { %v895_v9 = vpack.c.b16 %v322_v8, %v322_v8  ;;  %218 = vst.msk [vmem:[#allocation3 + $0x18] sm:$0xff] %vm210_vm1, %v825_v11  ;;  %272 = vrot.lane.b32.xlu2 %v271_v13, %s826_s21  ;;  %v909_v17 = vld [vmem:[#allocation2] sm:$0xff]  ;;  %v524_v21 = vunpack.c.l.b16 %v517_v16 }
  0x15   : > { %v911_v18 = vpack.c.b16 %v423_v15, %v423_v15  ;;  %v314_v20 = vld [vmem:[%s882_s19] sm:$0xf]  ;;  %v944_v60 = vld [vmem:[#allocation2 + $0x8] sm:$0xff]  ;;  %220 = vst.msk [vmem:[#allocation4] sm:$0xff] %vm219_vm3, %v825_v11 }
  0x16   : > { %v317_v24 = vunpack.c.l.b16 %v314_v20  ;;  %v923_v25 = vpack.c.b16 %v524_v21, %v524_v21  ;;  %v415_v27 = vld [vmem:[%s882_s19] sm:$0xf] }
  0x17   : > { %v418_v28 = vunpack.c.l.b16 %v415_v27  ;;  %v516_v30 = vld [vmem:[%s882_s19] sm:$0xf]  ;;  %v954_v0 = vld [vmem:[#allocation2 + $0x18] sm:$0xff] }
  0x18   : > { %724 = vmatmul.msk.bf16.vlgmr.msra.gmra.mxu0 %vm223_vm0, %v221_v2  ;;  %v318_v26 = vpack.c.b16 %v317_v24, %v317_v24  ;;  %v519_v31 = vunpack.c.l.b16 %v516_v30 }
  0x19   : > { %v419_v29 = vpack.c.b16 %v418_v28, %v418_v28 }
  0x1a   : > { %v520_v32 = vpack.c.b16 %v519_v31, %v519_v31 }
  0x1c   : > { %425 = vrot.lane.b32.xlu2 %v911_v18, %s827_s22 }
  0x24   : > { %526 = vrot.lane.b32.xlu2 %v923_v25, %s828_s23 }
  0x6e   : > { %v273_v33 = vpop.permute.xlu2 %272 }
  0x6f   : > { %v279_v37 = vsel %vm277_vm2, %v273_v33, 0 }
  0x70   : > { %288 = vmatpush.bf16.msra.mxu1 %v279_v37 }
  0x76   : > { %v426_v36 = vpop.permute.xlu2 %425 }
  0x77   : > { %v431_v38 = vsel %vm223_vm0, %v426_v36, 0 }
  0x78   : > { %440 = vmatpush.bf16.xpose.msrb.mxu1 %v431_v38 }
  0x7e   : > { %v527_v39 = vpop.permute.xlu2 %526 }
  0x7f   : > { %v532_v40 = vsel %vm223_vm0, %v527_v39, 0 }
  0x80   : > { %541 = vmatpush.bf16.xpose.msrb.mxu0 %v532_v40 }
  0x95   : > { %v890_v4 = vpop.f32.mrf.mxu0 }
  0x96   : > { %v244_v5 = vsel %vm223_vm0, %v890_v4, -inf }
  0x97   : > { %245 = vmax.xlane.f32.xlu0 %v244_v5 }
  0x9d   : > { %v241_v6 = vpop.f32.mrf.mxu0 }
  0xab   : > { %324 = vrot.lane.b32.xlu0 %v895_v9, %s824_s20 }
 0x10a   : > { %v246_v19 = vpop.xlane.xlu0 %245 }
 0x10b   : > { %v916_v22 = vmax.f32 %v909_v17, %v246_v19 }
 0x10d   : > { %v248_v23 = vsub.f32 %v909_v17, %v916_v22  ;;  %266 = vst.msk [vmem:[#allocation2] sm:$0xff] %vm210_vm1, %v916_v22  ;;  %253 = vperm.xlu1 %771, %v916_v22  }
 0x10f   : > { %v249_v6 = vmul.f32 1.442695, %v248_v23 }
 0x115   : > { %319 = vrot.lane.b32.xlu1 %v318_v26, %s824_s20 }
 0x11d   : > { %420 = vrot.lane.b32.xlu1 %v419_v29, %s827_s22  ;;  %v325_v34 = vpop.permute.xlu0 %324 }
 0x11e   : > { %v330_v35 = vsel %vm223_vm0, %v325_v34, 0  ;;  %v259_v34 = vld [vmem:[#allocation3] sm:$0xff] }
 0x11f   : > { %339 = vmatpush.bf16.xpose.msra.mxu2 %v330_v35 }
 0x125   : > { %521 = vrot.lane.b32.xlu1 %v520_v32, %s828_s23 }
 0x17f   : > { %v254_v41 = vpop.permute.xlu1 %253 }
 0x180   : > { %v256_v42 = vsub.f32 %v890_v4, %v254_v41  ;;  %v965_v4 = vld [vmem:[#allocation2 + $0x10] sm:$0xff] }
 0x182   : > { %v257_v43 = vmul.f32 1.442695, %v256_v42  ;;  %v363_v42 = vld [vmem:[#allocation3 + $0x8] sm:$0xff] }
 0x184   : > { %774 = vpow2.f32 %v257_v43 }
 0x185   : > { %776 = vpow2.f32 %v249_v6 }
 0x187   : > { %v320_v44 = vpop.permute.xlu1 %319 }
 0x188   : > { %726 = vmatmul.msk.bf16.vlgmr.msra.gmra.mxu2 %vm223_vm0, %v320_v44 }
 0x18a   : > { %v775_v45 = vpop.eup %774 }
 0x18b   : > { %v268_v46 = vpack.c.bf16 %v775_v45, %v775_v45  ;;  %v261_v10 = vsel %vm223_vm0, %v775_v45, 0.0 }
 0x18d   : > { %725 = vmatmul.msk.bf16.vlgmr.msra.gmra.mxu1 %vm223_vm0, %v268_v46 }
 0x18f   : > { %v421_v47 = vpop.permute.xlu1 %420 }
 0x197   : > { %v522_v48 = vpop.permute.xlu1 %521 }
 0x198   : > { %730 = vmatmul.msk.bf16.vlgmr.msrb.gmra.mxu0 %vm223_vm0, %v522_v48 }
 0x19d   : > { %728 = vmatmul.msk.bf16.vlgmr.msrb.gmra.mxu1 %vm223_vm0, %v421_v47 }
 0x20a   : > { %v938_v49 = vpop.f32.mrf.mxu1 }
 0x20b   : > { %v341_v50 = vpop.f32.mrf.mxu2 }
 0x20c   : > { %v347_v51 = vsel %vm223_vm0, %v341_v50, -inf }
 0x20d   : > { %348 = vmax.xlane.f32.xlu2 %v347_v51 }
 0x212   : > { %v292_v52 = vpop.f32.mrf.mxu1 }
 0x213   : > { %v343_v53 = vpop.f32.mrf.mxu2 }
 0x215   : > { %v543_v54 = vpop.f32.mrf.mxu0 }
 0x216   : > { %v549_v55 = vsel %vm223_vm0, %v543_v54, -inf }
 0x217   : > { %550 = vmax.xlane.f32.xlu1 %v549_v55 }
 0x21a   : > { %v442_v56 = vpop.f32.mrf.mxu1 }
 0x21b   : > { %v448_v57 = vsel %vm223_vm0, %v442_v56, -inf }
 0x21c   : > { %449 = vmax.xlane.f32.xlu0 %v448_v57 }
 0x21d   : > { %v545_v58 = vpop.f32.mrf.mxu0 }
 0x222   : > { %v444_v59 = vpop.f32.mrf.mxu1 }
 0x230   : > { %372 = vrot.lane.b32.xlu0 %v895_v9, %s829_s24  ;;  %v777_v9 = vpop.eup %776 }
 0x231   : > { %v260_v35 = vmul.f32 %v777_v9, %v259_v34 }
 0x280   : > { %v349_v61 = vpop.xlane.xlu2 %348 }
 0x281   : > { %v947_v62 = vmax.f32 %v944_v60, %v349_v61 }
 0x283   : > { %v351_v63 = vsub.f32 %v944_v60, %v947_v62  ;;  %369 = vst.msk [vmem:[#allocation2 + $0x8] sm:$0xff] %vm210_vm1, %v947_v62  ;;  %356 = vperm.xlu2 %772, %v947_v62  }
 0x285   : > { %v352_v38 = vmul.f32 1.442695, %v351_v63  ;;  %v299_v63 = vld [vmem:[#allocation4] sm:$0xff] }
 0x28a   : > { %v551_v1 = vpop.xlane.xlu1 %550 }
 0x28b   : > { %v957_v2 = vmax.f32 %v954_v0, %v551_v1  ;;  %473 = vrot.lane.b32.xlu2 %v911_v18, %s830_s25 }
 0x28d   : > { %v553_v3 = vsub.f32 %v954_v0, %v957_v2  ;;  %571 = vst.msk [vmem:[#allocation2 + $0x18] sm:$0xff] %vm210_vm1, %v957_v2  ;;  %558 = vperm.xlu0 %773, %v957_v2  }
 0x28f   : > { %v450_v5 = vpop.xlane.xlu0 %449 }
 0x290   : > { %v971_v7 = vmax.f32 %v965_v4, %v450_v5  ;;  %v464_v5 = vld [vmem:[#allocation3 + $0x10] sm:$0xff] }
 0x292   : > { %v452_v8 = vsub.f32 %v965_v4, %v971_v7  ;;  %470 = vst.msk [vmem:[#allocation2 + $0x10] sm:$0xff] %vm210_vm1, %v971_v7  ;;  %457 = vperm.xlu1 %771, %v971_v7  }
 0x293   : > { %574 = vrot.lane.b32.xlu2 %v923_v25, %s831_s26 }
 0x294   : > { %v453_v51 = vmul.f32 1.442695, %v452_v8 }
 0x29b   : > { %302 = vperm.xlu2 %772, %v777_v9  }
 0x2a2   : > { %v373_v12 = vpop.permute.xlu0 %372 }
 0x2a3   : > { %v378_v13 = vsel %vm277_vm2, %v373_v12, 0 }
 0x2a4   : > { %387 = vmatpush.bf16.msra.mxu3 %v378_v13 }
 0x2bc   : > { %262 = vadd.xlane.f32.xlu1 %v261_v10 }
 0x2dd   : > { %v357_v14 = vpop.permute.xlu2 %356 }
 0x2de   : > { %v359_v15 = vsub.f32 %v341_v50, %v357_v14  ;;  %v554_v50 = vmul.f32 1.442695, %v553_v3 }
 0x2e0   : > { %v360_v16 = vmul.f32 1.442695, %v359_v15 }
 0x2e2   : > { %778 = vpow2.f32 %v360_v16 }
 0x2e5   : > { %v474_v17 = vpop.permute.xlu2 %473 }
 0x2e6   : > { %v479_v22 = vsel %vm277_vm2, %v474_v17, 0 }
 0x2e7   : > { %488 = vmatpush.bf16.msrb.mxu3 %v479_v22 }
 0x2e8   : > { %v779_v18 = vpop.eup %778 }
 0x2e9   : > { %v365_v19 = vsel %vm223_vm0, %v779_v18, 0.0  ;;  %v371_v20 = vpack.c.bf16 %v779_v18, %v779_v18 }
 0x2ea   : > { %366 = vadd.xlane.f32.xlu2 %v365_v19 }
 0x2eb   : > { %727 = vmatmul.msk.bf16.vlgmr.msra.gmra.mxu3 %vm223_vm0, %v371_v20 }
 0x2ed   : > { %v575_v21 = vpop.permute.xlu2 %574 }
 0x2ee   : > { %v580_v23 = vsel %vm277_vm2, %v575_v21, 0 }
 0x2ef   : > { %589 = vmatpush.bf16.msrb.mxu2 %v580_v23 }
 0x2f5   : > { %v303_v41 = vpop.permute.xlu2 %302 }
 0x2f6   : > { %v305_v0 = vmul.f32 %v303_v41, %v299_v63 }
 0x2f8   : > { %v306_v1 = vadd.f32 %v305_v0, %v938_v49 }
 0x2ff   : > { %v559_v11 = vpop.permute.xlu0 %558 }
 0x300   : > { %v561_v24 = vsub.f32 %v543_v54, %v559_v11  ;;  %v565_v54 = vld [vmem:[#allocation3 + $0x18] sm:$0xff] }
 0x302   : > { %v562_v25 = vmul.f32 1.442695, %v561_v24 }
 0x304   : > { %780 = vpow2.f32 %v562_v25  ;;  %v458_v26 = vpop.permute.xlu1 %457 }
 0x305   : > { %v460_v27 = vsub.f32 %v442_v56, %v458_v26 }
 0x307   : > { %v461_v28 = vmul.f32 1.442695, %v460_v27 }
 0x309   : > { %782 = vpow2.f32 %v461_v28 }
 0x30a   : > { %v781_v29 = vpop.eup %780 }
 0x30b   : > { %v567_v30 = vsel %vm223_vm0, %v781_v29, 0.0  ;;  %v573_v31 = vpack.c.bf16 %v781_v29, %v781_v29 }
 0x30c   : > { %568 = vadd.xlane.f32.xlu1 %v567_v30 }
 0x30d   : > { %731 = vmatmul.msk.bf16.vlgmr.msrb.gmra.mxu2 %vm223_vm0, %v573_v31 }
 0x30f   : > { %v783_v32 = vpop.eup %782 }
 0x310   : > { %v472_v33 = vpack.c.bf16 %v783_v32, %v783_v32  ;;  %v466_v47 = vsel %vm223_vm0, %v783_v32, 0.0 }
 0x312   : > { %729 = vmatmul.msk.bf16.vlgmr.msrb.gmra.mxu3 %vm223_vm0, %v472_v33 }
 0x32f   : > { %v263_v36 = vpop.xlane.xlu1 %262 }
 0x330   : > { %v264_v37 = vadd.f32 %v263_v36, %v260_v35 }
 0x332   : > { %267 = vst.msk [vmem:[#allocation3] sm:$0xff] %vm210_vm1, %v264_v37  ;;  %784 = vrcp.f32 %v264_v37 }
 0x333   : > { %786 = vpow2.f32 %v352_v38 }
 0x338   : > { %v785_v39 = vpop.eup %784 }
 0x339   : > { %309 = vperm.xlu0 %773, %v785_v39   ;;  %v787_v40 = vpop.eup %786 }
 0x33a   : > { %v364_v43 = vmul.f32 %v787_v40, %v363_v42 }
 0x341   : > { %398 = vperm.xlu0 %773, %v787_v40  }
 0x35d   : > { %v367_v44 = vpop.xlane.xlu2 %366 }
 0x35e   : > { %v368_v45 = vadd.f32 %v367_v44, %v364_v43 }
 0x360   : > { %370 = vst.msk [vmem:[#allocation3 + $0x8] sm:$0xff] %vm210_vm1, %v368_v45  ;;  %788 = vrcp.f32 %v368_v45 }
 0x361   : > { %790 = vpow2.f32 %v554_v50 }
 0x362   : > { %792 = vpow2.f32 %v453_v51 }
 0x366   : > { %v789_v46 = vpop.eup %788 }
 0x367   : > { %409 = vperm.xlu2 %772, %v789_v46   ;;  %v791_v53 = vpop.eup %790 }
 0x368   : > { %v793_v55 = vpop.eup %792  ;;  %v566_v56 = vmul.f32 %v791_v53, %v565_v54 }
 0x369   : > { %v465_v7 = vmul.f32 %v793_v55, %v464_v5 }
 0x36b   : > { %467 = vadd.xlane.f32.xlu0 %v466_v47 }
 0x36e   : > { %v389_v48 = vpop.f32.mrf.mxu3 }
 0x36f   : > { %403 = vrot.lane.b32.xlu1 %v389_v48, %s832_s27 }
 0x376   : > { %v391_v52 = vpop.f32.mrf.mxu3 }
 0x37f   : > { %499 = vperm.xlu0 %773, %v793_v55   ;;  %v569_v57 = vpop.xlane.xlu1 %568 }
 0x380   : > { %v570_v58 = vadd.f32 %v569_v57, %v566_v56 }
 0x382   : > { %572 = vst.msk [vmem:[#allocation3 + $0x18] sm:$0xff] %vm210_vm1, %v570_v58 }
 0x390   : > { %v591_v59 = vpop.f32.mrf.mxu2 }
 0x391   : > { %605 = vrot.lane.b32.xlu0 %v591_v59, %s833_s28 }
 0x395   : > { %v490_v60 = vpop.f32.mrf.mxu3 }
 0x396   : > { %504 = vrot.lane.b32.xlu1 %v490_v60, %s834_s29 }
 0x398   : > { %v593_v61 = vpop.f32.mrf.mxu2 }
 0x39d   : > { %v492_v62 = vpop.f32.mrf.mxu3 }
 0x39e   : > { %600 = vperm.xlu1 %771, %v791_v53  }
 0x3ab   : > { %v310_v2 = vpop.permute.xlu0 %309 }
 0x3ac   : > { %v312_v3 = vmul.f32 %v310_v2, %v306_v1 }
 0x3ae   : > { %313 = vst.msk [vmem:[#allocation4] sm:$0xff] %vm223_vm0, %v312_v3 }
 0x3b3   : > { %v399_v4 = vpop.permute.xlu0 %398 }
 0x3b5   : > { %v395_v6 = vld [vmem:[#allocation4] sm:$0xff] }
 0x3b6   : > { %v401_v10 = vmul.f32 %v399_v4, %v395_v6 }
 0x3c1   : > { %v410_v14 = vpop.permute.xlu2 %409 }
 0x3de   : > { %v468_v8 = vpop.xlane.xlu0 %467 }
 0x3df   : > { %v469_v9 = vadd.f32 %v468_v8, %v465_v7 }
 0x3e1   : > { %471 = vst.msk [vmem:[#allocation3 + $0x10] sm:$0xff] %vm210_vm1, %v469_v9  ;;  %794 = vrcp.f32 %v469_v9  ;;  %v404_v12 = vpop.permute.xlu1 %403 }
 0x3e2   : > { %v406_v13 = vadd.f32 %v404_v12, %v401_v10  ;;  %796 = vrcp.f32 %v570_v58 }
 0x3e4   : > { %v412_v15 = vmul.f32 %v410_v14, %v406_v13 }
 0x3e6   : > { %414 = vst.msk [vmem:[#allocation4] sm:$0xff] %vm413_vm4, %v412_v15 }
 0x3e7   : > { %v795_v49 = vpop.eup %794 }
 0x3e8   : > { %510 = vperm.xlu2 %772, %v795_v49   ;;  %v797_v16 = vpop.eup %796 }
 0x3ed   : > { %v496_v18 = vld [vmem:[#allocation4] sm:$0xff] }
 0x3f0   : > { %611 = vperm.xlu2 %772, %v797_v16  }
 0x3f1   : > { %v500_v17 = vpop.permute.xlu0 %499 }
 0x3f2   : > { %v502_v20 = vmul.f32 %v500_v17, %v496_v18 }
 0x403   : > { %v606_v26 = vpop.permute.xlu0 %605 }
 0x408   : > { %v505_v19 = vpop.permute.xlu1 %504 }
 0x409   : > { %v507_v21 = vadd.f32 %v505_v19, %v502_v20 }
 0x410   : > { %v601_v11 = vpop.permute.xlu1 %600 }
 0x442   : > { %v511_v22 = vpop.permute.xlu2 %510 }
 0x443   : > { %v513_v23 = vmul.f32 %v511_v22, %v507_v21 }
 0x445   : > { %515 = vst.msk [vmem:[#allocation4] sm:$0xff] %vm514_vm5, %v513_v23 }
 0x44a   : > { %v612_v28 = vpop.permute.xlu2 %611 }
 0x44c   : > { %v597_v24 = vld [vmem:[#allocation4] sm:$0xff] }
 0x44d   : > { %v603_v25 = vmul.f32 %v601_v11, %v597_v24 }
 0x44f   : > { %v608_v27 = vadd.f32 %v606_v26, %v603_v25 }
 0x451   : > { %v614_v29 = vmul.f32 %v612_v28, %v608_v27 }
 0x453   : > { %616 = vst.msk [vmem:[#allocation4] sm:$0xff] %vm615_vm6, %v614_v29 }
 0x45a   : > { %v620_v30 = vld [vmem:[#allocation4] sm:$0xff] }
 0x45b   : > { %v621_v31 = vpack.c.bf16 %v620_v30, %v620_v30 }
 0x45d   : > { %623 = vst.msk [vmem:[%s204_s4] sm:$0xf] %vm622_vm7, %v621_v31 }
 0x45e PF: > { %s12_s11 = sadd.s32 1, %s820_s11   ;;  %s1021_s9 = smov %s816_s10 }
 0x45f   : > { %p9_p5 = scmp.ge.s32.totalorder %s12_s11, 4   ;;  %s1022_s10 = smov %s1024_s12 }
 0x461   :  { %11 = sbr.rel (!%p9_p5) target bundleno = 2 (0x2), region = 75 }

// kernel: transformer_encoder_layer.5
= control target key start
LH: loop header
LB: loop body
LE: loop exit
PB: predicated region body
PF: predicated region fallthrough
CT: control target
= control target key end

     0   :  { %vm67_vm0 = vcmask 261120   ;;  %v399_v14 = vmov 32.0   ;;  %vm156_vm6 = vcmask 257024   ;;  %s536_s2 = inlined_call_operand.vmem [shape: bf16[32,32], index: 2, kind: input, shape index: {}]   ;;  %s537_s3 = inlined_call_operand.vmem [shape: f32[1,32], index: 3, kind: input, shape index: {}]   ;;  %s538_s0 = inlined_call_operand.vmem [shape: bf16[16,32], index: 0, kind: input, shape index: {}]   ;;  %s539_s1 = inlined_call_operand.vmem [shape: f32[16,32], index: 1, kind: input, shape index: {}]   ;;  %s540_s4 = inlined_call_operand.vmem [shape: f32[1,32], index: 4, kind: input, shape index: {}]   ;;  %s541_s5 = inlined_call_operand.vmem [shape: f32[1,32], index: 5, kind: input, shape index: {}]   ;;  %s542_s7 = inlined_call_operand.vmem [shape: f32[1,128], index: 7, kind: input, shape index: {}]   ;;  %s543_s6 = inlined_call_operand.vmem [shape: bf16[32,128], index: 6, kind: input, shape index: {}]   ;;  %s544_s8 = inlined_call_operand.vmem [shape: bf16[128,32], index: 8, kind: input, shape index: {}]   ;;  %s545_s9 = inlined_call_operand.vmem [shape: f32[1,32], index: 9, kind: input, shape index: {}]   ;;  %s546_s10 = inlined_call_operand.vmem [shape: f32[16,32], index: 10, kind: output, shape index: {}]  }
   0x1   :  { %v374_v0 = vld [vmem:[%s536_s2 + $0x8] sm:$0xff]  ;;  %v373_v1 = vld [vmem:[%s536_s2] sm:$0xff]  ;;  %393 = vrcp.f32 %v399_v14  ;;  %v385_v43 = vld [vmem:[%s544_s8 + $0x38] sm:$0xff] }
   0x2   :  { %77 = vmatpush.bf16.msra.mxu0 %v374_v0  ;;  %v372_v2 = vld [vmem:[%s538_s0] sm:$0xff]  ;;  %v86_v10 = vld [vmem:[%s539_s1 + $0x8] sm:$0xff]  ;;  %275 = vmatpush.bf16.msra.mxu2 %v385_v43  ;;  %v384_v45 = vld [vmem:[%s544_s8 + $0x30] sm:$0xff] }
   0x3   :  { %v388_v3 = vld [vmem:[%s537_s3] ss:$0 sm:$0xff]  ;;  %v377_v34 = vld [vmem:[%s543_s6 + $0x8] sm:$0xff] }
   0x4   :  { %v85_v5 = vld [vmem:[%s539_s1] sm:$0xff]  ;;  %198 = vmatpush.bf16.msra.mxu1 %v377_v34  ;;  %v383_v52 = vld [vmem:[%s544_s8 + $0x28] sm:$0xff] }
   0x5   :  { %v376_v37 = vld [vmem:[%s543_s6] sm:$0xff] }
   0x6   :  { %78 = vmatpush.bf16.msra.mxu0 %v373_v1  ;;  %v389_v49 = vld [vmem:[%s540_s4] ss:$0 sm:$0xff]  ;;  %276 = vmatpush.bf16.msra.mxu2 %v384_v45 }
   0x7   :  { %v394_v15 = vpop.eup %393  ;;  %v390_v53 = vld [vmem:[%s541_s5] ss:$0 sm:$0xff] }
   0x8   :  { %v98_v16 = vmul.f32 32.0, %v394_v15  ;;  %vm102_vm1 = vweird.f32 %v394_v15  ;;  %199 = vmatpush.bf16.msra.mxu1 %v376_v37  ;;  %v382_v58 = vld [vmem:[%s544_s8 + $0x20] sm:$0xff] }
   0x9   :  { %326 = vmatmul.msk.bf16.vlgmr.msra.gmra.mxu0 %vm67_vm0, %v372_v2 }
   0xa   :  { %v99_v17 = vsub.f32 1.0, %v98_v16  ;;  %277 = vmatpush.bf16.msra.mxu2 %v383_v52 }
   0xc   :  { %v100_v18 = vmul.f32 %v394_v15, %v99_v17 }
   0xe   :  { %v101_v19 = vadd.f32 %v394_v15, %v100_v18  ;;  %278 = vmatpush.bf16.msra.mxu2 %v382_v58 }
  0x10   :  { %v103_v20 = vsel %vm102_vm1, %v394_v15, %v101_v19 }
  0x86   :  { %v80_v4 = vpop.f32.mrf.mxu0 }
  0x87   :  { %v81_v6 = vadd.f32 %v388_v3, %v80_v4  ;;  %v381_v4 = vld [vmem:[%s544_s8 + $0x18] sm:$0xff] }
  0x88   :  { %279 = vmatpush.bf16.msra.mxu2 %v381_v4 }
  0x89   :  { %v87_v7 = vadd.f32 %v85_v5, %v81_v6  ;;  %v380_v5 = vld [vmem:[%s544_s8 + $0x10] sm:$0xff]  ;;  %v379_v6 = vld [vmem:[%s544_s8 + $0x8] sm:$0xff] }
  0x8b   :  { %89 = vst.msk [vmem:[#allocation2] sm:$0xff] %vm67_vm0, %v87_v7  ;;  %v91_v8 = vsel %vm67_vm0, %v87_v7, 0.0 }
  0x8c   :  { %92 = vadd.xlane.f32.xlu0 %v91_v8  ;;  %280 = vmatpush.bf16.msra.mxu2 %v380_v5  ;;  %v400_v8 = vmov 0.0  }
  0x8d   :  { %159 = vst.msk [vmem:[#allocation4] sm:$0xff] %vm67_vm0, %v400_v8 }
  0x8e   :  { %v82_v9 = vpop.f32.mrf.mxu0  ;;  %160 = vst.msk [vmem:[#allocation4 + $0x8] sm:$0xff] %vm67_vm0, %v400_v8 }
  0x8f   :  { %v83_v11 = vadd.f32 %v388_v3, %v82_v9 }
  0x90   :  { %281 = vmatpush.bf16.msra.mxu2 %v379_v6 }
  0x91   :  { %v88_v12 = vadd.f32 %v86_v10, %v83_v11  ;;  %v391_v10 = vld [vmem:[%s542_s7] ss:$0 sm:$0xff] }
  0x93   :  { %90 = vst.msk [vmem:[#allocation2 + $0x8] sm:$0xff] %vm67_vm0, %v88_v12  ;;  %v94_v13 = vsel %vm67_vm0, %v88_v12, 0.0 }
  0x94   :  { %95 = vadd.xlane.f32.xlu0 %v94_v13  ;;  %v208_v17 = vld [vmem:[#allocation4] sm:$0xff] }
  0xff   :  { %v93_v21 = vpop.xlane.xlu0 %92 }
 0x100   :  { %v104_v22 = vmul.f32 %v103_v20, %v93_v21 }
 0x102   :  { %v106_v23 = vsub.f32 %v87_v7, %v104_v22  ;;  %v378_v7 = vld [vmem:[%s544_s8] sm:$0xff] }
 0x103   :  { %282 = vmatpush.bf16.msra.mxu2 %v378_v7  ;;  %v392_v22 = vld [vmem:[%s545_s9] ss:$0 sm:$0xff] }
 0x104   :  { %v108_v24 = vmul.f32 %v106_v23, %v106_v23 }
 0x106   :  { %v110_v25 = vsel %vm67_vm0, %v108_v24, 0.0  ;;  %v296_v24 = vld [vmem:[#allocation2] sm:$0xff] }
 0x107   :  { %111 = vadd.xlane.f32.xlu1 %v110_v25  ;;  %v96_v26 = vpop.xlane.xlu0 %95 }
 0x108   :  { %v105_v27 = vmul.f32 %v103_v20, %v96_v26 }
 0x10a   :  { %v107_v28 = vsub.f32 %v88_v12, %v105_v27 }
 0x10c   :  { %v109_v29 = vmul.f32 %v107_v28, %v107_v28 }
 0x10e   :  { %v113_v30 = vsel %vm67_vm0, %v109_v29, 0.0 }
 0x10f   :  { %114 = vadd.xlane.f32.xlu1 %v113_v30 }
 0x17a   :  { %v112_v31 = vpop.xlane.xlu1 %111 }
 0x17b   :  { %v116_v32 = vmul.f32 %v112_v31, %v103_v20 }
 0x17d   :  { %v118_v33 = vadd.f32 1e-12, %v116_v32 }
 0x17f   :  { %395 = vrsqrt.f32 %v118_v33  ;;  %vm126_vm3 = vweird.f32 %v118_v33 }
 0x182   :  { %v115_v35 = vpop.xlane.xlu1 %114 }
 0x183   :  { %v117_v36 = vmul.f32 %v115_v35, %v103_v20  ;;  %v209_v20 = vld [vmem:[#allocation4 + $0x8] sm:$0xff] }
 0x185   :  { %v396_v38 = vpop.eup %395  ;;  %v119_v39 = vadd.f32 1e-12, %v117_v36 }
 0x186   :  { %v121_v40 = vmul.f32 %v396_v38, %v118_v33  ;;  %vm127_vm2 = vweird.f32 %v396_v38 }
 0x187   :  { %397 = vrsqrt.f32 %v119_v39  ;;  %vm128_vm4 = vmor %vm126_vm3, %vm127_vm2  ;;  %vm136_vm7 = vweird.f32 %v119_v39 }
 0x188   :  { %v122_v41 = vmul.f32 %v396_v38, %v121_v40 }
 0x18a   :  { %v123_v42 = vmul.f32 0.5, %v122_v41 }
 0x18c   :  { %v124_v44 = vsub.f32 1.5, %v123_v42 }
 0x18d   :  { %v398_v46 = vpop.eup %397 }
 0x18e   :  { %v125_v47 = vmul.f32 %v396_v38, %v124_v44  ;;  %v131_v48 = vmul.f32 %v398_v46, %v119_v39  ;;  %vm137_vm5 = vweird.f32 %v398_v46 }
 0x18f   :  { %vm138_vm8 = vmor %vm136_vm7, %vm137_vm5 }
 0x190   :  { %v129_v50 = vsel %vm128_vm4, %v396_v38, %v125_v47  ;;  %v132_v51 = vmul.f32 %v398_v46, %v131_v48 }
 0x191   :  { %v140_v54 = vmul.f32 %v129_v50, %v106_v23 }
 0x192   :  { %v133_v55 = vmul.f32 0.5, %v132_v51 }
 0x193   :  { %v146_v56 = vmul.f32 %v389_v49, %v140_v54 }
 0x194   :  { %v134_v57 = vsub.f32 1.5, %v133_v55 }
 0x195   :  { %v152_v59 = vadd.f32 %v390_v53, %v146_v56 }
 0x196   :  { %v135_v60 = vmul.f32 %v398_v46, %v134_v57 }
 0x197   :  { %v154_v61 = vpack.c.bf16 %v152_v59, %v152_v59 }
 0x198   :  { %v139_v62 = vsel %vm138_vm8, %v398_v46, %v135_v60 }
 0x199   :  { %157 = vst.msk [vmem:[#allocation3] sm:$0xf] %vm156_vm6, %v154_v61  ;;  %v141_v63 = vmul.f32 %v139_v62, %v107_v28  ;;  %v297_v28 = vld [vmem:[#allocation2 + $0x8] sm:$0xff] }
 0x19b   :  { %v147_v0 = vmul.f32 %v389_v49, %v141_v63 }
 0x19d   :  { %v153_v1 = vadd.f32 %v390_v53, %v147_v0 }
 0x19f   :  { %v155_v2 = vpack.c.bf16 %v153_v1, %v153_v1 }
 0x1a1   :  { %158 = vst.msk [vmem:[#allocation3 + $0x4] sm:$0xf] %vm156_vm6, %v155_v2 }
 0x1a8   :  { %v375_v3 = vld [vmem:[#allocation3] sm:$0xff] }
 0x1a9   :  { %339 = vmatmul.msk.bf16.vlgmr.msra.gmra.mxu1 %vm67_vm0, %v375_v3 }
 0x226   :  { %v201_v9 = vpop.f32.mrf.mxu1 }
 0x227   :  { %v202_v11 = vadd.f32 %v391_v10, %v201_v9 }
 0x229   :  { %v206_v14 = vmax.f32 %v202_v11, 0.0 }
 0x22e   :  { %v203_v12 = vpop.f32.mrf.mxu1 }
 0x22f   :  { %v204_v13 = vadd.f32 %v391_v10, %v203_v12 }
 0x231   :  { %v207_v15 = vmax.f32 %v204_v13, 0.0 }
 0x233   :  { %v210_v16 = vpack.c.bf16 %v207_v15, %v206_v14 }
 0x235   :  { %283 = vmatmul.bf16.vlgmr.msra.gmra.mxu2 %v210_v16 }
 0x2b8   :  { %v284_v18 = vpop.f32.mrf.mxu2 }
 0x2b9   :  { %v289_v19 = vadd.f32 %v284_v18, %v208_v17 }
 0x2bb   :  { %291 = vst.msk [vmem:[#allocation4] sm:$0xff] %vm67_vm0, %v289_v19 }
 0x2c0   :  { %v286_v21 = vpop.f32.mrf.mxu2 }
 0x2c1   :  { %v290_v23 = vadd.f32 %v286_v21, %v209_v20 }
 0x2c2   :  { %v298_v25 = vld [vmem:[#allocation4] sm:$0xff] }
 0x2c3   :  { %v300_v26 = vadd.f32 %v298_v25, %v296_v24  ;;  %292 = vst.msk [vmem:[#allocation4 + $0x8] sm:$0xff] %vm67_vm0, %v290_v23 }
 0x2c5   :  { %v306_v27 = vadd.f32 %v392_v22, %v300_v26 }
 0x2c7   :  { %308 = vst.msk [vmem:[%s546_s10] sm:$0xff] %vm67_vm0, %v306_v27 }
 0x2ca   :  { %v299_v29 = vld [vmem:[#allocation4 + $0x8] sm:$0xff] }
 0x2cb   :  { %v301_v30 = vadd.f32 %v299_v29, %v297_v28 }
 0x2cd   :  { %v307_v31 = vadd.f32 %v392_v22, %v301_v30 }
 0x2cf   :  { %309 = vst.msk [vmem:[%s546_s10 + $0x8] sm:$0xff] %vm67_vm0, %v307_v31 }

</bundles_post_ra>
